<compile_context>
chip_gen: v6e
topology: v6e:2x2x1
jax: 0.10.0
libtpu: 0.0.40
codegen_flags: <defaults>
</compile_context>

<pallas_src>
import functools

import jax
import jax.numpy as jnp
from jax.experimental import pallas as pl
from jax.experimental.pallas import tpu as pltpu


def swiglu_kernel(x_ref, w1_ref, w3_ref, w2_ref, o_ref, acc_ref):
    """Grid = (S // tm, F // tf); axis 1 is the reduction over the hidden dim F."""
    fi = pl.program_id(1)

    @pl.when(fi == 0)
    def _():
        acc_ref[...] = jnp.zeros_like(acc_ref)

    x = x_ref[...]                                                    # (tm, D) bf16
    # Gate and up projections on the MXU, fp32 results.
    a = jnp.dot(x, w1_ref[...], preferred_element_type=jnp.float32)  # (tm, tf)
    b = jnp.dot(x, w3_ref[...], preferred_element_type=jnp.float32)  # (tm, tf)
    h = (a * jax.nn.sigmoid(a)) * b                                   # silu(a)*b, fp32
    # Down projection, accumulated in fp32 across the F reduction.
    acc_ref[...] += jnp.dot(h.astype(w2_ref.dtype), w2_ref[...],
                            preferred_element_type=jnp.float32)

    @pl.when(fi == pl.num_programs(1) - 1)
    def _():
        o_ref[...] = acc_ref[...].astype(o_ref.dtype)


def _vmem_capacity_bytes():
    try:
        return int(pltpu.get_tpu_info().vmem_capacity_bytes)
    except Exception:
        return 64 << 20  # conservative fallback: v7x per-TC VMEM


def _divisor_tile(total, requested, align):
    """Largest t <= requested with t % align == 0 and total % t == 0.
    Falls back to the full dimension (always a legal block shape)."""
    if total <= align or total % align != 0:
        return total
    t = min(requested, total)
    t -= t % align
    while t >= align:
        if total % t == 0:
            return t
        t -= align
    return total


def _footprint_bytes(tm, tf, D, cb, ob):
    """VMEM footprint: double-buffered tiles + accumulator + fp32 temporaries."""
    return (2 * (tm * D * cb            # x tile (double-buffered)
                 + 2 * D * tf * cb      # w1 + w3 tiles
                 + tf * D * cb          # w2 tile
                 + tm * D * ob)         # output tile
            + tm * D * 4                # fp32 accumulator scratch
            + 2 * tm * tf * 4           # fp32 a, b matmul results
            + tm * tf * cb)             # bf16 copy of h fed to the MXU


def swiglu_ffn(x, w1, w3, w2, *, tm=None, tf=None,
               compute_dtype=jnp.bfloat16, out_dtype=None):
    """Fused SwiGLU FFN.  Prefer make_swiglu_ffn() in a real model so the weight
    casts are done once instead of on every forward call."""
    S, D = x.shape
    D1, F = w1.shape
    assert D1 == D and w3.shape == (D, F) and w2.shape == (F, D)
    out_dtype = compute_dtype if out_dtype is None else out_dtype

    cb = jnp.dtype(compute_dtype).itemsize
    ob = jnp.dtype(out_dtype).itemsize

    vmem_cap = _vmem_capacity_bytes()
    vmem_budget = int(vmem_cap * 0.85)        # headroom for compiler-internal scratch
    small_vmem = vmem_cap < (100 << 20)       # v7x-sized part (64 MiB / TC)

    # Generation-aware defaults.  The kernel is weight-bandwidth bound at real
    # shapes: HBM weight traffic scales with the number of row passes S/tm, so
    # pick tm as large as VMEM allows (v6e: 1024/512 ~= 77 MiB of 128 MiB;
    # v7x: 768/256 ~= 50 MiB of 64 MiB with a bf16 output tile).
    tm_req = tm if tm is not None else (768 if small_vmem else 1024)
    tf_req = tf if tf is not None else (256 if small_vmem else 512)

    while True:
        tm_ = _divisor_tile(S, tm_req, 16)    # sublane packing for bf16 rows
        tf_ = _divisor_tile(F, tf_req, 128)   # lane alignment
        if _footprint_bytes(tm_, tf_, D, cb, ob) <= vmem_budget:
            break
        if tm_req > 64:
            tm_req //= 2
        elif tf_req > 128:
            tf_req //= 2
        else:
            break
    tm, tf = tm_, tf_

    # On 2-TensorCore parts keep >= 2 blocks on the parallel i axis so both
    # cores get work (a single i-block would idle one TC).
    if small_vmem and S // tm == 1 and S % 32 == 0:
        tm = S // 2

    needed = _footprint_bytes(tm, tf, D, cb, ob)
    vmem_limit = max(min(int(needed * 1.2), vmem_cap), min(32 << 20, vmem_cap))

    xc = x.astype(compute_dtype)
    w1c = w1.astype(compute_dtype)
    w3c = w3.astype(compute_dtype)
    w2c = w2.astype(compute_dtype)

    grid = (S // tm, F // tf)
    return pl.pallas_call(
        swiglu_kernel,
        out_shape=jax.ShapeDtypeStruct((S, D), out_dtype),
        grid_spec=pltpu.PrefetchScalarGridSpec(
            num_scalar_prefetch=0,
            grid=grid,
            in_specs=[
                pl.BlockSpec((tm, D), lambda i, f: (i, 0)),   # x rows
                pl.BlockSpec((D, tf), lambda i, f: (0, f)),   # w1 F-tile
                pl.BlockSpec((D, tf), lambda i, f: (0, f)),   # w3 F-tile
                pl.BlockSpec((tf, D), lambda i, f: (f, 0)),   # w2 F-tile
            ],
            out_specs=pl.BlockSpec((tm, D), lambda i, f: (i, 0)),
            scratch_shapes=[pltpu.VMEM((tm, D), jnp.float32)],
        ),
        compiler_params=pltpu.CompilerParams(
            dimension_semantics=("parallel", "arbitrary"),
            vmem_limit_bytes=vmem_limit,
        ),
    )(xc, w1c, w3c, w2c)


def make_swiglu_ffn(w1, w3, w2, *, compute_dtype=jnp.bfloat16, out_dtype=None,
                    tm=None, tf=None):
    """Cast/stage the weights ONCE (hoisted out of the per-forward path) and
    return a jitted forward function x -> swiglu(x)."""
    w1c = jnp.asarray(w1, dtype=compute_dtype)
    w3c = jnp.asarray(w3, dtype=compute_dtype)
    w2c = jnp.asarray(w2, dtype=compute_dtype)
    fwd = functools.partial(swiglu_ffn, tm=tm, tf=tf,
                            compute_dtype=compute_dtype, out_dtype=out_dtype)
    return jax.jit(lambda x: fwd(x, w1c, w3c, w2c))


def swiglu_ref_fp32(x, w1, w3, w2):
    a = x @ w1
    return (jax.nn.silu(a) * (x @ w3)) @ w2


def swiglu_ref_bf16(x, w1, w3, w2):
    # Mirrors the kernel's numerics: bf16 MXU inputs, fp32 accumulation/silu.
    xb = x.astype(jnp.bfloat16)
    a = jnp.dot(xb, w1.astype(jnp.bfloat16), preferred_element_type=jnp.float32)
    b = jnp.dot(xb, w3.astype(jnp.bfloat16), preferred_element_type=jnp.float32)
    h = ((a * jax.nn.sigmoid(a)) * b).astype(jnp.bfloat16)
    return jnp.dot(h, w2.astype(jnp.bfloat16), preferred_element_type=jnp.float32)


if __name__ == "__main__":
    # Small shapes consistent with the module's [S, D] @ [D, F], [F, D] forward
    # (real module: D=4096, F=14336).  Chosen so the grid exercises both axes.
    S, D, F = 512, 256, 1024
    key = jax.random.PRNGKey(0)
    kx, k1, k2, k3 = jax.random.split(key, 4)

    # Deterministic synthetic parameters (the module's nn.Parameters are
    # uninitialized torch.empty, so any deterministic init is faithful).
    x = jax.random.normal(kx, (S, D), dtype=jnp.float32)
    w1 = jax.random.normal(k1, (D, F), dtype=jnp.float32) * 0.02
    w3 = jax.random.normal(k3, (D, F), dtype=jnp.float32) * 0.02
    w2 = jax.random.normal(k2, (F, D), dtype=jnp.float32) * 0.02

    fwd = make_swiglu_ffn(w1, w3, w2)           # weights cast/staged once
    out = jax.block_until_ready(fwd(x))

    assert out.shape == (S, D)
    out_f32 = out.astype(jnp.float32)
    ref_b = swiglu_ref_bf16(x, w1, w3, w2)      # numerics-matched reference
    ref_f = swiglu_ref_fp32(x, w1, w3, w2)      # module-semantics reference
    assert jnp.allclose(out_f32, ref_b, atol=5e-3, rtol=2e-2), "mismatch vs bf16 reference"
    assert jnp.allclose(out_f32, ref_f, atol=2e-2, rtol=5e-2), "mismatch vs fp32 reference"
    print("KERNEL_OK")
</pallas_src>

<mosaic_0001>
module attributes {stable_mosaic.version = 11 : i64} {
  func.func @swiglu_kernel(%arg0: i32, %arg1: i32, %arg2: memref<256x256xbf16, #tpu.memory_space<vmem>>, %arg3: memref<256x256xbf16, #tpu.memory_space<vmem>>, %arg4: memref<256x256xbf16, #tpu.memory_space<vmem>>, %arg5: memref<256x256xbf16, #tpu.memory_space<vmem>>, %arg6: memref<256x256xbf16, #tpu.memory_space<vmem>>, %arg7: memref<256x256xf32, #tpu.memory_space<vmem>>) attributes {dimension_semantics = [#tpu.dimension_semantics<parallel>, #tpu.dimension_semantics<arbitrary>], iteration_bounds = array<i64: 2, 4>, scalar_prefetch = 0 : i64, scratch_operands = 1 : i64, tpu.core_type = #tpu.core_type<tc>, window_params = [{transform_indices = @transform_0, window_bounds = array<i64: 256, 256>}, {transform_indices = @transform_1, window_bounds = array<i64: 256, 256>}, {transform_indices = @transform_2, window_bounds = array<i64: 256, 256>}, {transform_indices = @transform_3, window_bounds = array<i64: 256, 256>}, {transform_indices = @transform_4, window_bounds = array<i64: 256, 256>}]} {
    %c0_i32 = arith.constant 0 : i32
    %0 = arith.cmpi eq, %arg1, %c0_i32 : i32
    %1 = arith.extui %0 : i1 to i32
    %c0_i32_0 = arith.constant 0 : i32
    %2 = arith.cmpi ne, %1, %c0_i32_0 : i32
    scf.if %2 {
      %cst_16 = arith.constant 0.000000e+00 : f32
      %24 = vector.broadcast %cst_16 : f32 to vector<256x256xf32>
      %c0_17 = arith.constant 0 : index
      %c0_18 = arith.constant 0 : index
      %25 = vector.load %arg7[%c0_17, %c0_18] : memref<256x256xf32, #tpu.memory_space<vmem>>, vector<256x256xf32>
      tpu.vector_store %arg7[%c0_17, %c0_18], %24 {strides = array<i32>} : memref<256x256xf32, #tpu.memory_space<vmem>>, vector<256x256xf32>,
    } else {
    }
    %c0 = arith.constant 0 : index
    %c0_1 = arith.constant 0 : index
    %3 = vector.load %arg2[%c0, %c0_1] : memref<256x256xbf16, #tpu.memory_space<vmem>>, vector<256x256xbf16>
    %c0_2 = arith.constant 0 : index
    %c0_3 = arith.constant 0 : index
    %4 = vector.load %arg3[%c0_2, %c0_3] : memref<256x256xbf16, #tpu.memory_space<vmem>>, vector<256x256xbf16>
    %cst = arith.constant dense<0.000000e+00> : vector<256x256xf32>
    %5 = tpu.matmul %3, %4, %cst {dimension_numbers = #tpu.dot_dimension_numbers<[1], [0], [0], [1], [0, 0, 1, 1], [], []>} : vector<256x256xbf16>, vector<256x256xbf16>, vector<256x256xf32> -> vector<256x256xf32>
    %c0_4 = arith.constant 0 : index
    %c0_5 = arith.constant 0 : index
    %6 = vector.load %arg4[%c0_4, %c0_5] : memref<256x256xbf16, #tpu.memory_space<vmem>>, vector<256x256xbf16>
    %cst_6 = arith.constant dense<0.000000e+00> : vector<256x256xf32>
    %7 = tpu.matmul %3, %6, %cst_6 {dimension_numbers = #tpu.dot_dimension_numbers<[1], [0], [0], [1], [0, 0, 1, 1], [], []>} : vector<256x256xbf16>, vector<256x256xbf16>, vector<256x256xf32> -> vector<256x256xf32>
    %8 = arith.negf %5 : vector<256x256xf32>
    %9 = math.exp %8 : vector<256x256xf32>
    %cst_7 = arith.constant 1.000000e+00 : f32
    %10 = vector.broadcast %cst_7 : f32 to vector<256x256xf32>
    %11 = arith.addf %10, %9 : vector<256x256xf32>
    %12 = arith.divf %10, %11 : vector<256x256xf32>
    %13 = arith.mulf %5, %12 : vector<256x256xf32>
    %14 = arith.mulf %13, %7 : vector<256x256xf32>
    %c0_8 = arith.constant 0 : index
    %c0_9 = arith.constant 0 : index
    %15 = vector.load %arg7[%c0_8, %c0_9] : memref<256x256xf32, #tpu.memory_space<vmem>>, vector<256x256xf32>
    %16 = arith.truncf %14 : vector<256x256xf32> to vector<256x256xbf16>
    %c0_10 = arith.constant 0 : index
    %c0_11 = arith.constant 0 : index
    %17 = vector.load %arg5[%c0_10, %c0_11] : memref<256x256xbf16, #tpu.memory_space<vmem>>, vector<256x256xbf16>
    %cst_12 = arith.constant dense<0.000000e+00> : vector<256x256xf32>
    %18 = tpu.matmul %16, %17, %cst_12 {dimension_numbers = #tpu.dot_dimension_numbers<[1], [0], [0], [1], [0, 0, 1, 1], [], []>} : vector<256x256xbf16>, vector<256x256xbf16>, vector<256x256xf32> -> vector<256x256xf32>
    %19 = arith.addf %15, %18 : vector<256x256xf32>
    %c0_13 = arith.constant 0 : index
    %c0_14 = arith.constant 0 : index
    %20 = vector.load %arg7[%c0_13, %c0_14] : memref<256x256xf32, #tpu.memory_space<vmem>>, vector<256x256xf32>
    tpu.vector_store %arg7[%c0_13, %c0_14], %19 {strides = array<i32>} : memref<256x256xf32, #tpu.memory_space<vmem>>, vector<256x256xf32>,
    %c3_i32 = arith.constant 3 : i32
    %21 = arith.cmpi eq, %arg1, %c3_i32 : i32
    %22 = arith.extui %21 : i1 to i32
    %c0_i32_15 = arith.constant 0 : i32
    %23 = arith.cmpi ne, %22, %c0_i32_15 : i32
    scf.if %23 {
      %c0_16 = arith.constant 0 : index
      %c0_17 = arith.constant 0 : index
      %24 = vector.load %arg7[%c0_16, %c0_17] : memref<256x256xf32, #tpu.memory_space<vmem>>, vector<256x256xf32>
      %25 = arith.truncf %24 : vector<256x256xf32> to vector<256x256xbf16>
      %c0_18 = arith.constant 0 : index
      %c0_19 = arith.constant 0 : index
      %26 = vector.load %arg6[%c0_18, %c0_19] : memref<256x256xbf16, #tpu.memory_space<vmem>>, vector<256x256xbf16>
      tpu.vector_store %arg6[%c0_18, %c0_19], %25 {strides = array<i32>} : memref<256x256xbf16, #tpu.memory_space<vmem>>, vector<256x256xbf16>,
    } else {
    }
    return
  }
  func.func @transform_0(%arg0: i32, %arg1: i32) -> (i32, i32) {
    %c0_i32 = arith.constant 0 : i32
    %c0_i32_0 = arith.constant 0 : i32
    return %arg0, %c0_i32 : i32, i32
  }
  func.func @transform_1(%arg0: i32, %arg1: i32) -> (i32, i32) {
    %c0_i32 = arith.constant 0 : i32
    %c0_i32_0 = arith.constant 0 : i32
    return %c0_i32, %arg1 : i32, i32
  }
  func.func @transform_2(%arg0: i32, %arg1: i32) -> (i32, i32) {
    %c0_i32 = arith.constant 0 : i32
    %c0_i32_0 = arith.constant 0 : i32
    return %c0_i32, %arg1 : i32, i32
  }
  func.func @transform_3(%arg0: i32, %arg1: i32) -> (i32, i32) {
    %c0_i32 = arith.constant 0 : i32
    %c0_i32_0 = arith.constant 0 : i32
    return %arg1, %c0_i32 : i32, i32
  }
  func.func @transform_4(%arg0: i32, %arg1: i32) -> (i32, i32) {
    %c0_i32 = arith.constant 0 : i32
    %c0_i32_0 = arith.constant 0 : i32
    return %arg0, %c0_i32 : i32, i32
  }
}

</mosaic_0001>

<bundles_post_ra>
// kernel: _lambda_.1
= control target key start
LH: loop header
LB: loop body
LE: loop exit
PB: predicated region body
PF: predicated region fallthrough
CT: control target
= control target key end

     0   :  { %s4976_s0 = inlined_call_operand.vmem [shape: bf16[512,256], index: 0, kind: input, shape index: {}]   ;;  %s4977_s1 = inlined_call_operand.hbm [shape: bf16[256,1024], index: 1, kind: input, shape index: {}]   ;;  %s4978_s2 = inlined_call_operand.hbm [shape: bf16[256,1024], index: 2, kind: input, shape index: {}]   ;;  %s4979_s3 = inlined_call_operand.vmem [shape: bf16[1024,256], index: 3, kind: input, shape index: {}]   ;;  %s4980_s4 = inlined_call_operand.hbm [shape: bf16[512,256], index: 4, kind: output, shape index: {}]  }
   0x1   :  { %5004 = sst [smem:[#allocation35_spill]] %s4977_s1 }
   0x2   :  { %9 = vsyncpa [#allocation4], 0 }
   0x3   :  { %11 = vsyncpa [#allocation4 + $0x1], 0 }
   0x4   :  { %12 = vsyncpa [#allocation7], 0 }
   0x5   :  { %14 = vsyncpa [#allocation7 + $0x1], 0 }
   0x6   :  { %15 = vsyncpa [#allocation5], 0 }
   0x7   :  { %17 = vsyncpa [#allocation5 + $0x1], 0  ;;  %s4009_s15 = smov 0   ;;  %s4011_s16 = smov 0  }
   0x8   :  { %s4013_s17 = smov 0   ;;  %s4015_s18 = smov 0  }
   0x9   :  { %s4017_s19 = smov 0   ;;  %s4019_s20 = smov 0  }
   0xa   :  { %s4021_s21 = smov 0   ;;  %s4023_s22 = smov 0  }
   0xb   :  { %s4025_s23 = smov 0   ;;  %s4027_s24 = smov 0  }
   0xc   :  { %s4029_s25 = smov 0  }
   0xd LB: > { %5005 = sst [smem:[#allocation12_spill]] %s3941_s17  ;;  %s2910_s26 = sadd.s32 4294967295, %s3973_s25   ;;  %s3973_s25 = sphi %s4029_s25, %s23_s25   ;;  %s3969_s24 = sphi %s4027_s24, %s5059_s24   ;;  %s3965_s23 = sphi %s4025_s23, %s5065_s23   ;;  %s3961_s22 = sphi %s4023_s22, %s5057_s22   ;;  %s3957_s21 = sphi %s4021_s21, %s5064_s21   ;;  %s3953_s20 = sphi %s4019_s20, %s5056_s20   ;;  %s3949_s19 = sphi %s4017_s19, %s5063_s19   ;;  %s3945_s18 = sphi %s4015_s18, %s5062_s18   ;;  %s3941_s17 = sphi %s4013_s17, %s5054_s17   ;;  %s3937_s16 = sphi %s4011_s16, %s5061_s16   ;;  %s3933_s15 = sphi %s4009_s15, %s5060_s15  }
   0xe   : > { %5006 = sst [smem:[#allocation13_spill]] %s3953_s20  ;;  %s2911_s27 = sadd.s32 4294967294, %s3973_s25  }
   0xf   : > { %5007 = sst [smem:[#allocation14_spill]] %s3969_s24  ;;  %s32_s28 = sadd.s32 1, %s3965_s23 }
  0x10   : > { %s35_s29 = sadd.s32 1, %s3969_s24  ;;  %p33_p0 = scmp.ge.s32.totalorder %s32_s28, 4 }
  0x11   : > { %s68_s30 = sadd.s32 1, %s3953_s20  ;;  %p75_p1 = scmp.ne.s32.totalorder %s3953_s20, %s3949_s19 }
  0x12   : > { %p76_p2 = scmp.eq.s32.totalorder %s3973_s25, 0  ;;  %s5067_s28 = smov (%p33_p0, %s32_s28), 0 }
  0x13   : > { %5008 = sst [smem:[#allocation15_spill]] %s5067_s28  ;;  %s5069_s29 = smov (!%p33_p0, %s35_s29), %s3969_s24 }
  0x14   : > { %s65_s5 = ssub.s32 %s3965_s23, %s5067_s28  ;;  %p4075_p3 = por %p76_p2, %p75_p1 }
  0x15   : > { %p37_p4 = scmp.ge.s32.totalorder %s5069_s29, 2  ;;  %p66_p5 = scmp.eq.s32.totalorder %s65_s5, 0 }
  0x16   : > { %p81_p6 = scmp.ne.s32.totalorder %s3949_s19, %s3945_s18  ;;  %p82_p7 = scmp.eq.s32.totalorder %s2910_s26, 0 }
  0x17   : > { %s5071_s29 = smov (%p37_p4, %s5069_s29), 0  ;;  %s146_s10 = sadd.s32 1, %s3941_s17 }
  0x18   : > { %5010 = sst [smem:[#allocation16_spill]] %s5071_s29  ;;  %p4085_p8 = por %p82_p7, %p81_p6 }
  0x19   : > { %s4083_s7 = scalar_select %p66_p5, %s3953_s20, %s68_s30  }
  0x1a   : > { %s143_s9 = ssub.s32 %s3969_s24, %s5071_s29  ;;  %p156_p10 = scmp.ne.s32.totalorder %s3941_s17, %s3937_s16 }
  0x1b   : > { %5011 = sst [smem:[#allocation17_spill]] %s4083_s7  ;;  %p144_p9 = scmp.eq.s32.totalorder %s143_s9, 0 }
  0x1c   : > { %p157_p11 = scmp.eq.s32.totalorder %s2910_s26, 7  ;;  %p162_p13 = scmp.ne.s32.totalorder %s3937_s16, %s3933_s15 }
  0x1d   : > { %s4095_s11 = scalar_select %p144_p9, %s3941_s17, %s146_s10  }
  0x1e   : > { %p4097_p12 = por %p157_p11, %p156_p10  ;;  %p163_p0 = scmp.eq.s32.totalorder %s2911_s27, 7 }
  0x1f   : > { %5013 = sst [smem:[#allocation18_spill]] %s4095_s11  ;;  %p3249_p1 = scmp.lt.s32.totalorder %s3973_s25, 8 }
  0x20   : > { %s4105_s13 = sand.u32 1, %s3953_s20   ;;  %p4107_p2 = por %p163_p0, %p162_p13 }
  0x21   : > { %s4984_s18 = sshll.u32 %s4105_s13, 8  ;;  %s4985_s26 = sshll.u32 %s3965_s23, 7 }
  0x22   : > { %s5015_s14 = scalar_select %p4107_p2, 1, 0 }
  0x23   : > { %s5017_s1 = sld [smem:[#allocation35_spill]]  ;;  %s197_s10 = scalar_lea.vmem [#allocation3], %s4984_s18 }
  0x24   : > { %5016 = sst [smem:[#allocation19_spill]] %s5015_s14  ;;  %s204_s27 = sshll.u32 %s197_s10, 4  ;;  %s205_s27 = int_to_ptr.vmem [resolvable:$true] %s204_s27 }
  0x25   : > { %p4122_p4 = pnand %p3249_p1, %p4075_p3  ;;  %p2920_p5 = scmp.ge.s32.totalorder %s3973_s25, 1 }
  0x26   : > { %s194_s28 = scalar_lea.sflag [#allocation4], %s4105_s13  ;;  %s3806_s24 = scalar_lea.vmem %s205_s27, 4096 }
  0x27   : > { %p3795_p6 = pneg %p4122_p4  ;;  %p3807_p7 = scmp.ne.s32.totalorder %s205_s27, %s3806_s24 }
  0x28   : > { %s3975_s30 = smov [#allocation3]  }
  0x29   : > { %s203_s9 = scalar_lea.hbm %s5017_s1, %s4985_s26  ;;  %p3809_p9 = pnand %p3807_p7, %p3795_p6 }
  0x2a   : > { %s3811_s5 = sshll.u32 %s3975_s30, 4  ;;  %s3812_s5 = int_to_ptr.vmem [resolvable:$false] %s3811_s5 }
  0x2b   : > { %p3810_p10 = pneg %p3809_p9  ;;  %s3813_s6 = scalar_lea.vmem %s3812_s5, 8192 }
  0x2c   : > { %p3814_p3 = scmp.lt.s32.totalorder %s205_s27, %s3812_s5  ;;  %p3815_p11 = scmp.lt.s32.totalorder %s3813_s6, %s3806_s24 }
  0x2e   : > { %p3816_p13 = por %p3815_p11, %p3814_p3 }
  0x30   : > { %p3817_p0 = pnand %p3816_p13, %p3810_p10 }
  0x32   : > { %3820 = shalt.err (!%p3817_p0)
}
  0x33   : > { %s3976_s10 = smov 512   ;;  %s3977_s18 = smov 128  }
  0x34   : > { %s3978_s26 = smov 8   ;;  %p243_p1 = scmp.lt.s32.totalorder %s3973_s25, 9 }
  0x35   : > { %3241 = dma.hbm_to_vmem [thread:$0]  (!%p4122_p4), %s203_s9, 4096, %s205_s27, %s194_s28, %s3976_s10, %s3977_s18, %s3978_s26  }
  0x36   : > { %s5019_s30 = sshll.u32 %s3965_s23, 7  ;;  %p4143_p7 = pnand %p2920_p5, %p243_p1 }
  0x37   : > { %s224_s24 = scalar_lea.hbm %s4978_s2, %s5019_s30  ;;  %s5021_s7 = sshll.u32 %s4105_s13, 8 }
  0x38   : > { %s218_s20 = scalar_lea.vmem [#allocation6], %s5021_s7  ;;  %s215_s17 = scalar_lea.sflag [#allocation7], %s4105_s13 }
  0x39   : > { %s225_s11 = sshll.u32 %s218_s20, 4  ;;  %s3979_s28 = smov [#allocation6]   ;;  %s226_s11 = int_to_ptr.vmem [resolvable:$true] %s225_s11 }
  0x3a   : > { %s3834_s14 = scalar_lea.vmem %s226_s11, 4096  ;;  %s3839_s9 = sshll.u32 %s3979_s28, 4  ;;  %s3840_s9 = int_to_ptr.vmem [resolvable:$false] %s3839_s9 }
  0x3b   : > { %p3835_p9 = scmp.ne.s32.totalorder %s226_s11, %s3834_s14  ;;  %s3841_s1 = scalar_lea.vmem %s3840_s9, 8192 }
  0x3c   : > { %p3842_p11 = scmp.lt.s32.totalorder %s226_s11, %s3840_s9  ;;  %p3843_p5 = scmp.lt.s32.totalorder %s3841_s1, %s3834_s14 }
  0x3d   : > { %p3837_p10 = pnand %p3835_p9, %p3795_p6 }
  0x3e   : > { %p3844_p13 = por %p3843_p5, %p3842_p11 }
  0x3f   : > { %p3838_p3 = pneg %p3837_p10 }
  0x41   : > { %p3845_p0 = pnand %p3844_p13, %p3838_p3 }
  0x43   : > { %3848 = shalt.err (!%p3845_p0)
}
  0x44   : > { %3244 = dma.hbm_to_vmem [thread:$0]  (!%p4122_p4), %s224_s24, 4096, %s226_s11, %s215_s17, %s3976_s10, %s3977_s18, %s3978_s26  }
  0x45   : > { %247 = sbr.rel (%p4143_p7) target bundleno = 843 (0x34b), region = 36 }
  0x4a   : > { %s249_s20 = sand.u32 1, %s3949_s19  }
  0x4b   : > { %s2921_s7 = sshll.u32 %s249_s20, 8  ;;  %s250_s13 = scalar_lea.sflag [#allocation4], %s249_s20 }
  0x4c   : > { %s4158_s27 = scalar_lea.vmem [#allocation3], %s2921_s7 }
  0x4d   : > { %3920 = dma.done.wait (%p4085_p8), %s250_s13, 4096  }
  0x4e   : > { %3922 = vsyncadd (%p4085_p8), %s250_s13, 4294963200  ;;  %s259_s14 = scalar_lea.sflag [#allocation7], %s249_s20  ;;  %s4164_s30 = scalar_lea.vmem [#allocation6], %s2921_s7 }
  0x4f   : > { %3924 = dma.done.wait (%p4085_p8), %s259_s14, 4096  }
  0x50   : > { %3926 = vsyncadd (%p4085_p8), %s259_s14, 4294963200  ;;  %s301_s17 = sand.u32 1, %s3937_s16   ;;  %s2924_s29 = sshll.u32 %s3961_s22, 5 }
  0x51   : > { %s2923_s11 = sshll.u32 %s301_s17, 8  ;;  %p305_p4 = scmp.lt.s32.totalorder %s2924_s29, 63 }
  0x52   : > { %s2927_s18 = sshll.u32 %s3957_s21, 5  ;;  %s4185_s1 = scalar_lea.vmem [#allocation8], %s2923_s11 }
  0x53   : > { %s5073_s29 = smov (!%p305_p4, %s2924_s29), 63  ;;  %p314_p6 = scmp.lt.s32.totalorder %s2927_s18, 127 }
  0x54   : > { %s3164_s26 = sshll.u32 %s5073_s29, 3  ;;  %p2930_p8 = scmp.ne.s32.totalorder %s3957_s21, 0 }
  0x55   : > { %s4178_s24 = scalar_lea.vmem %s4976_s0, %s3164_s26  ;;  %s5075_s18 = smov (!%p314_p6, %s2927_s18), 127 }
  0x56   : > { %s3165_s8 = sshll.u32 %s5075_s18, 3  ;;  %324 = sbr.rel (%p2930_p8) target bundleno = 124 (0x7c), region = 48 }
  0x57   : > { %s4183_s9 = scalar_lea.vmem %s4979_s3, %s3165_s8 }
  0x5b   : > { %v3980_v0 = vmov 0.0  }
  0x5c   : > { %325 = vst [vmem:[#allocation2 + $0xb0] sm:$0xff] %v3980_v0  ;;  %326 = vst [vmem:[#allocation2 + $0x1b0] sm:$0xff] %v3980_v0 }
  0x5d   : > { %327 = vst [vmem:[#allocation2 + $0xd8] sm:$0xff] %v3980_v0  ;;  %328 = vst [vmem:[#allocation2 + $0x18] sm:$0xff] %v3980_v0 }
  0x5e   : > { %329 = vst [vmem:[#allocation2 + $0x50] sm:$0xff] %v3980_v0  ;;  %330 = vst [vmem:[#allocation2 + $0x168] sm:$0xff] %v3980_v0 }
  0x5f   : > { %331 = vst [vmem:[#allocation2 + $0x130] sm:$0xff] %v3980_v0  ;;  %332 = vst [vmem:[#allocation2 + $0x48] sm:$0xff] %v3980_v0 }
  0x60   : > { %333 = vst [vmem:[#allocation2 + $0x180] sm:$0xff] %v3980_v0  ;;  %334 = vst [vmem:[#allocation2 + $0x110] sm:$0xff] %v3980_v0 }
  0x61   : > { %335 = vst [vmem:[#allocation2 + $0x118] sm:$0xff] %v3980_v0  ;;  %336 = vst [vmem:[#allocation2 + $0x98] sm:$0xff] %v3980_v0 }
  0x62   : > { %337 = vst [vmem:[#allocation2 + $0x120] sm:$0xff] %v3980_v0  ;;  %338 = vst [vmem:[#allocation2 + $0x150] sm:$0xff] %v3980_v0 }
  0x63   : > { %339 = vst [vmem:[#allocation2 + $0x108] sm:$0xff] %v3980_v0  ;;  %340 = vst [vmem:[#allocation2 + $0x60] sm:$0xff] %v3980_v0 }
  0x64   : > { %341 = vst [vmem:[#allocation2 + $0xe0] sm:$0xff] %v3980_v0  ;;  %342 = vst [vmem:[#allocation2 + $0x188] sm:$0xff] %v3980_v0 }
  0x65   : > { %343 = vst [vmem:[#allocation2 + $0x138] sm:$0xff] %v3980_v0  ;;  %344 = vst [vmem:[#allocation2 + $0x140] sm:$0xff] %v3980_v0 }
  0x66   : > { %345 = vst [vmem:[#allocation2 + $0x80] sm:$0xff] %v3980_v0  ;;  %346 = vst [vmem:[#allocation2 + $0x1a8] sm:$0xff] %v3980_v0 }
  0x67   : > { %347 = vst [vmem:[#allocation2 + $0x1b8] sm:$0xff] %v3980_v0  ;;  %348 = vst [vmem:[#allocation2 + $0x28] sm:$0xff] %v3980_v0 }
  0x68   : > { %349 = vst [vmem:[#allocation2 + $0x1e8] sm:$0xff] %v3980_v0  ;;  %350 = vst [vmem:[#allocation2 + $0xf8] sm:$0xff] %v3980_v0 }
  0x69   : > { %351 = vst [vmem:[#allocation2 + $0x160] sm:$0xff] %v3980_v0  ;;  %352 = vst [vmem:[#allocation2 + $0x30] sm:$0xff] %v3980_v0 }
  0x6a   : > { %353 = vst [vmem:[#allocation2 + $0x1e0] sm:$0xff] %v3980_v0  ;;  %354 = vst [vmem:[#allocation2] sm:$0xff] %v3980_v0 }
  0x6b   : > { %355 = vst [vmem:[#allocation2 + $0xf0] sm:$0xff] %v3980_v0  ;;  %356 = vst [vmem:[#allocation2 + $0x8] sm:$0xff] %v3980_v0 }
  0x6c   : > { %357 = vst [vmem:[#allocation2 + $0x148] sm:$0xff] %v3980_v0  ;;  %358 = vst [vmem:[#allocation2 + $0x1d0] sm:$0xff] %v3980_v0 }
  0x6d   : > { %359 = vst [vmem:[#allocation2 + $0x100] sm:$0xff] %v3980_v0  ;;  %360 = vst [vmem:[#allocation2 + $0xc8] sm:$0xff] %v3980_v0 }
  0x6e   : > { %361 = vst [vmem:[#allocation2 + $0x40] sm:$0xff] %v3980_v0  ;;  %362 = vst [vmem:[#allocation2 + $0x1f8] sm:$0xff] %v3980_v0 }
  0x6f   : > { %363 = vst [vmem:[#allocation2 + $0x20] sm:$0xff] %v3980_v0  ;;  %364 = vst [vmem:[#allocation2 + $0x128] sm:$0xff] %v3980_v0 }
  0x70   : > { %365 = vst [vmem:[#allocation2 + $0x1a0] sm:$0xff] %v3980_v0  ;;  %366 = vst [vmem:[#allocation2 + $0x1f0] sm:$0xff] %v3980_v0 }
  0x71   : > { %367 = vst [vmem:[#allocation2 + $0xe8] sm:$0xff] %v3980_v0  ;;  %368 = vst [vmem:[#allocation2 + $0x78] sm:$0xff] %v3980_v0 }
  0x72   : > { %369 = vst [vmem:[#allocation2 + $0x70] sm:$0xff] %v3980_v0  ;;  %370 = vst [vmem:[#allocation2 + $0x90] sm:$0xff] %v3980_v0 }
  0x73   : > { %371 = vst [vmem:[#allocation2 + $0x1d8] sm:$0xff] %v3980_v0  ;;  %372 = vst [vmem:[#allocation2 + $0xd0] sm:$0xff] %v3980_v0 }
  0x74   : > { %373 = vst [vmem:[#allocation2 + $0xb8] sm:$0xff] %v3980_v0  ;;  %374 = vst [vmem:[#allocation2 + $0x88] sm:$0xff] %v3980_v0 }
  0x75   : > { %375 = vst [vmem:[#allocation2 + $0xa8] sm:$0xff] %v3980_v0  ;;  %376 = vst [vmem:[#allocation2 + $0x1c8] sm:$0xff] %v3980_v0 }
  0x76   : > { %377 = vst [vmem:[#allocation2 + $0x170] sm:$0xff] %v3980_v0  ;;  %378 = vst [vmem:[#allocation2 + $0x178] sm:$0xff] %v3980_v0 }
  0x77   : > { %379 = vst [vmem:[#allocation2 + $0x68] sm:$0xff] %v3980_v0  ;;  %380 = vst [vmem:[#allocation2 + $0x190] sm:$0xff] %v3980_v0 }
  0x78   : > { %381 = vst [vmem:[#allocation2 + $0x198] sm:$0xff] %v3980_v0  ;;  %382 = vst [vmem:[#allocation2 + $0x38] sm:$0xff] %v3980_v0 }
  0x79   : > { %383 = vst [vmem:[#allocation2 + $0xc0] sm:$0xff] %v3980_v0  ;;  %384 = vst [vmem:[#allocation2 + $0x1c0] sm:$0xff] %v3980_v0 }
  0x7a   : > { %385 = vst [vmem:[#allocation2 + $0x158] sm:$0xff] %v3980_v0  ;;  %386 = vst [vmem:[#allocation2 + $0x10] sm:$0xff] %v3980_v0 }
  0x7b   : > { %387 = vst [vmem:[#allocation2 + $0x58] sm:$0xff] %v3980_v0  ;;  %388 = vst [vmem:[#allocation2 + $0xa0] sm:$0xff] %v3980_v0 }
  0x7c PF: > { %v3345_v1 = vld [vmem:[%s4158_s27 + $0x74] ss:$8 sps:$4 sm:$0xff]   ;;  %v3347_v2 = vld [vmem:[%s4158_s27 + $0x70] ss:$8 sps:$4 sm:$0xff]   ;;  %v3348_v3 = vld [vmem:[%s4158_s27 + $0x64] ss:$8 sps:$4 sm:$0xff]  }
  0x7d   : > { %773 = vmatprep.subr.bf16.mxu0 %v3345_v1  ;;  %3200 = vmatprep.subr.bf16.mxu1 %v3345_v1  ;;  %v3350_v4 = vld [vmem:[%s4158_s27 + $0x60] ss:$8 sps:$4 sm:$0xff]   ;;  %v3351_v5 = vld [vmem:[%s4158_s27 + $0x54] ss:$8 sps:$4 sm:$0xff]   ;;  %v3353_v6 = vld [vmem:[%s4158_s27 + $0x50] ss:$8 sps:$4 sm:$0xff]  }
  0x7e   : > { %774 = vmatpush1.bf16.msra.mxu0 %v3347_v2  ;;  %3216 = vmatpush1.bf16.msra.mxu1 %v3347_v2  ;;  %v3354_v7 = vld [vmem:[%s4158_s27 + $0x44] ss:$8 sps:$4 sm:$0xff]   ;;  %v3356_v8 = vld [vmem:[%s4158_s27 + $0x40] ss:$8 sps:$4 sm:$0xff]   ;;  %v3357_v9 = vld [vmem:[%s4158_s27 + $0x34] ss:$8 sps:$4 sm:$0xff]  }
  0x7f   : > { %775 = vmatprep.subr.bf16.mxu0 %v3348_v3  ;;  %3201 = vmatprep.subr.bf16.mxu1 %v3348_v3  ;;  %v3359_v10 = vld [vmem:[%s4158_s27 + $0x30] ss:$8 sps:$4 sm:$0xff]   ;;  %v3360_v11 = vld [vmem:[%s4158_s27 + $0x24] ss:$8 sps:$4 sm:$0xff]   ;;  %v3362_v12 = vld [vmem:[%s4158_s27 + $0x20] ss:$8 sps:$4 sm:$0xff]  }
  0x80   : > { %v3363_v13 = vld [vmem:[%s4158_s27 + $0x14] ss:$8 sps:$4 sm:$0xff]   ;;  %v4266_v14 = vld [vmem:[%s4178_s24 + $0x4] ss:$8 sps:$4 sm:$0xff]   ;;  %v3365_v15 = vld [vmem:[%s4158_s27 + $0x10] ss:$8 sps:$4 sm:$0xff]  }
  0x81   : > { %v4270_v16 = vld [vmem:[%s4178_s24 + $0x84] ss:$8 sps:$4 sm:$0xff]   ;;  %805 = vmatprep.mubr.bf16.mxu0 %v4266_v14  ;;  %v3368_v18 = vld [vmem:[%s4158_s27] ss:$8 sps:$4 sm:$0xff]   ;;  %v3369_v19 = vld [vmem:[%s4158_s27 + $0xf4] ss:$8 sps:$4 sm:$0xff]  }
  0x82   : > { %776 = vmatpush1.bf16.msra.mxu0 %v3350_v4  ;;  %3217 = vmatpush1.bf16.msra.mxu1 %v3350_v4  ;;  %v3366_v17 = vld [vmem:[%s4158_s27 + $0x4] ss:$8 sps:$4 sm:$0xff]   ;;  %v3371_v20 = vld [vmem:[%s4158_s27 + $0xf0] ss:$8 sps:$4 sm:$0xff]   ;;  %v3374_v22 = vld [vmem:[%s4158_s27 + $0xe0] ss:$8 sps:$4 sm:$0xff]  }
  0x83   : > { %777 = vmatprep.subr.bf16.mxu0 %v3351_v5  ;;  %3202 = vmatprep.subr.bf16.mxu1 %v3351_v5  ;;  %v3372_v21 = vld [vmem:[%s4158_s27 + $0xe4] ss:$8 sps:$4 sm:$0xff]   ;;  %v3375_v23 = vld [vmem:[%s4158_s27 + $0xd4] ss:$8 sps:$4 sm:$0xff]   ;;  %v3377_v24 = vld [vmem:[%s4158_s27 + $0xd0] ss:$8 sps:$4 sm:$0xff]  }
  0x84   : > { %885 = vmatprep.mubr.bf16.mxu1 %v4270_v16  ;;  %v3378_v25 = vld [vmem:[%s4158_s27 + $0xc4] ss:$8 sps:$4 sm:$0xff]   ;;  %v3380_v26 = vld [vmem:[%s4158_s27 + $0xc0] ss:$8 sps:$4 sm:$0xff]   ;;  %v3381_v27 = vld [vmem:[%s4158_s27 + $0xb4] ss:$8 sps:$4 sm:$0xff]  }
  0x85   : > { %v3383_v28 = vld [vmem:[%s4158_s27 + $0xb0] ss:$8 sps:$4 sm:$0xff]   ;;  %v3384_v29 = vld [vmem:[%s4158_s27 + $0xa4] ss:$8 sps:$4 sm:$0xff]   ;;  %v3386_v30 = vld [vmem:[%s4158_s27 + $0xa0] ss:$8 sps:$4 sm:$0xff]  }
  0x86   : > { %778 = vmatpush1.bf16.msra.mxu0 %v3353_v6  ;;  %3218 = vmatpush1.bf16.msra.mxu1 %v3353_v6  ;;  %v3387_v31 = vld [vmem:[%s4158_s27 + $0x94] ss:$8 sps:$4 sm:$0xff]   ;;  %v3389_v32 = vld [vmem:[%s4158_s27 + $0x90] ss:$8 sps:$4 sm:$0xff]   ;;  %v3390_v33 = vld [vmem:[%s4158_s27 + $0x84] ss:$8 sps:$4 sm:$0xff]  }
  0x87   : > { %779 = vmatprep.subr.bf16.mxu0 %v3354_v7  ;;  %3203 = vmatprep.subr.bf16.mxu1 %v3354_v7  ;;  %v3392_v34 = vld [vmem:[%s4158_s27 + $0x80] ss:$8 sps:$4 sm:$0xff]   ;;  %v3401_v36 = vld [vmem:[%s4164_s30 + $0x74] ss:$8 sps:$4 sm:$0xff]   ;;  %v3399_v38 = vld [vmem:[%s4164_s30 + $0x70] ss:$8 sps:$4 sm:$0xff]  }
  0x88   : > { %v4293_v35 = vld [vmem:[%s4178_s24] ss:$8 sps:$4 sm:$0xff]   ;;  %v3404_v39 = vld [vmem:[%s4164_s30 + $0x64] ss:$8 sps:$4 sm:$0xff]   ;;  %v4302_v40 = vld [vmem:[%s4178_s24 + $0x14] ss:$8 sps:$4 sm:$0xff]  }
  0x89   : > { %v4297_v37 = vld [vmem:[%s4178_s24 + $0x80] ss:$8 sps:$4 sm:$0xff]   ;;  %v4305_v41 = vld [vmem:[%s4178_s24 + $0x94] ss:$8 sps:$4 sm:$0xff]   ;;  %v4314_v44 = vld [vmem:[%s4178_s24 + $0x10] ss:$8 sps:$4 sm:$0xff]  }
  0x8a   : > { %780 = vmatpush1.bf16.msra.mxu0 %v3356_v8  ;;  %3219 = vmatpush1.bf16.msra.mxu1 %v3356_v8  ;;  %v3402_v42 = vld [vmem:[%s4164_s30 + $0x60] ss:$8 sps:$4 sm:$0xff]   ;;  %v3413_v43 = vld [vmem:[%s4164_s30 + $0x54] ss:$8 sps:$4 sm:$0xff]   ;;  %v4317_v45 = vld [vmem:[%s4178_s24 + $0x90] ss:$8 sps:$4 sm:$0xff]  }
  0x8b   : > { %781 = vmatprep.subr.bf16.mxu0 %v3357_v9  ;;  %3204 = vmatprep.subr.bf16.mxu1 %v3357_v9  ;;  %v3411_v46 = vld [vmem:[%s4164_s30 + $0x50] ss:$8 sps:$4 sm:$0xff]   ;;  %v4321_v47 = vld [vmem:[%s4178_s24 + $0x24] ss:$8 sps:$4 sm:$0xff]   ;;  %v3414_v50 = vld [vmem:[%s4164_s30 + $0x40] ss:$8 sps:$4 sm:$0xff]  }
  0x8c   : > { %v3416_v48 = vld [vmem:[%s4164_s30 + $0x44] ss:$8 sps:$4 sm:$0xff]   ;;  %v3425_v51 = vld [vmem:[%s4164_s30 + $0x34] ss:$8 sps:$4 sm:$0xff]   ;;  %v4334_v52 = vld [vmem:[%s4178_s24 + $0x20] ss:$8 sps:$4 sm:$0xff]  }
  0x8d   : > { %v4325_v49 = vld [vmem:[%s4178_s24 + $0xa4] ss:$8 sps:$4 sm:$0xff]   ;;  %v4337_v53 = vld [vmem:[%s4178_s24 + $0xa0] ss:$8 sps:$4 sm:$0xff]   ;;  %v3423_v54 = vld [vmem:[%s4164_s30 + $0x30] ss:$8 sps:$4 sm:$0xff]  }
  0x8e   : > { %782 = vmatpush1.bf16.msra.mxu0 %v3359_v10  ;;  %3220 = vmatpush1.bf16.msra.mxu1 %v3359_v10  ;;  %v4341_v55 = vld [vmem:[%s4178_s24 + $0x34] ss:$8 sps:$4 sm:$0xff]   ;;  %v3428_v56 = vld [vmem:[%s4164_s30 + $0x24] ss:$8 sps:$4 sm:$0xff]   ;;  %v3426_v58 = vld [vmem:[%s4164_s30 + $0x20] ss:$8 sps:$4 sm:$0xff]  }
  0x8f   : > { %783 = vmatprep.subr.bf16.mxu0 %v3360_v11  ;;  %3205 = vmatprep.subr.bf16.mxu1 %v3360_v11  ;;  %v4345_v57 = vld [vmem:[%s4178_s24 + $0xb4] ss:$8 sps:$4 sm:$0xff]   ;;  %v4354_v60 = vld [vmem:[%s4178_s24 + $0x30] ss:$8 sps:$4 sm:$0xff]   ;;  %v4361_v63 = vld [vmem:[%s4178_s24 + $0x44] ss:$8 sps:$4 sm:$0xff]  }
  0x90   : > { %v3437_v59 = vld [vmem:[%s4164_s30 + $0x14] ss:$8 sps:$4 sm:$0xff]   ;;  %v4357_v61 = vld [vmem:[%s4178_s24 + $0xb0] ss:$8 sps:$4 sm:$0xff]   ;;  %v3440_v0 = vld [vmem:[%s4164_s30 + $0x4] ss:$8 sps:$4 sm:$0xff]  }
  0x91   : > { %v3435_v62 = vld [vmem:[%s4164_s30 + $0x10] ss:$8 sps:$4 sm:$0xff]   ;;  %v4365_v1 = vld [vmem:[%s4178_s24 + $0xc4] ss:$8 sps:$4 sm:$0xff]   ;;  %v3438_v2 = vld [vmem:[%s4164_s30] ss:$8 sps:$4 sm:$0xff]  }
  0x92   : > { %784 = vmatpush1.bf16.msra.mxu0 %v3362_v12  ;;  %3221 = vmatpush1.bf16.msra.mxu1 %v3362_v12  ;;  %v3449_v3 = vld [vmem:[%s4164_s30 + $0xf4] ss:$8 sps:$4 sm:$0xff]   ;;  %v4374_v4 = vld [vmem:[%s4178_s24 + $0x40] ss:$8 sps:$4 sm:$0xff]   ;;  %v3447_v6 = vld [vmem:[%s4164_s30 + $0xf0] ss:$8 sps:$4 sm:$0xff]  }
  0x93   : > { %785 = vmatprep.subr.bf16.mxu0 %v3363_v13  ;;  %3206 = vmatprep.subr.bf16.mxu1 %v3363_v13  ;;  %v4377_v5 = vld [vmem:[%s4178_s24 + $0xc0] ss:$8 sps:$4 sm:$0xff]   ;;  %v4381_v7 = vld [vmem:[%s4178_s24 + $0x54] ss:$8 sps:$4 sm:$0xff]   ;;  %v3452_v8 = vld [vmem:[%s4164_s30 + $0xe4] ss:$8 sps:$4 sm:$0xff]  }
  0x94   : > { %v4385_v9 = vld [vmem:[%s4178_s24 + $0xd4] ss:$8 sps:$4 sm:$0xff]   ;;  %v3450_v10 = vld [vmem:[%s4164_s30 + $0xe0] ss:$8 sps:$4 sm:$0xff]   ;;  %v4394_v12 = vld [vmem:[%s4178_s24 + $0x50] ss:$8 sps:$4 sm:$0xff]  }
  0x95   : > { %v3461_v11 = vld [vmem:[%s4164_s30 + $0xd4] ss:$8 sps:$4 sm:$0xff]   ;;  %v4397_v13 = vld [vmem:[%s4178_s24 + $0xd0] ss:$8 sps:$4 sm:$0xff]   ;;  %p3123_p1 = scmp.ne.s32.totalorder %s3957_s21, 3 }
  0x96   : > { %786 = vmatpush1.bf16.msra.mxu0 %v3365_v15  ;;  %3222 = vmatpush1.bf16.msra.mxu1 %v3365_v15  ;;  %v3459_v15 = vld [vmem:[%s4164_s30 + $0xd0] ss:$8 sps:$4 sm:$0xff]  }
  0x97   : > { %787 = vmatprep.subr.bf16.mxu0 %v3366_v17  ;;  %3207 = vmatprep.subr.bf16.mxu1 %v3366_v17  ;;  %v4401_v17 = vld [vmem:[%s4178_s24 + $0x64] ss:$8 sps:$4 sm:$0xff]  }
  0x9a   : > { %788 = vmatpush1.bf16.msra.mxu0 %v3368_v18  ;;  %3223 = vmatpush1.bf16.msra.mxu1 %v3368_v18  ;;  %v3464_v18 = vld [vmem:[%s4164_s30 + $0xc4] ss:$8 sps:$4 sm:$0xff]  }
  0x9b   : > { %789 = vmatprep.subr.bf16.mxu0 %v3369_v19  ;;  %3208 = vmatprep.subr.bf16.mxu1 %v3369_v19  ;;  %v4405_v19 = vld [vmem:[%s4178_s24 + $0xe4] ss:$8 sps:$4 sm:$0xff]  }
  0x9e   : > { %790 = vmatpush2.bf16.msra.mxu0 %v3371_v20  ;;  %3224 = vmatpush2.bf16.msra.mxu1 %v3371_v20  ;;  %v3462_v20 = vld [vmem:[%s4164_s30 + $0xc0] ss:$8 sps:$4 sm:$0xff]  }
  0x9f   : > { %791 = vmatprep.subr.bf16.mxu0 %v3372_v21  ;;  %3209 = vmatprep.subr.bf16.mxu1 %v3372_v21  ;;  %v3473_v21 = vld [vmem:[%s4164_s30 + $0xb4] ss:$8 sps:$4 sm:$0xff]  }
  0xa2   : > { %792 = vmatpush2.bf16.msra.mxu0 %v3374_v22  ;;  %3225 = vmatpush2.bf16.msra.mxu1 %v3374_v22  ;;  %v3469_v22 = vld [vmem:[%s4178_s24 + $0x60] ss:$8 sps:$4 sm:$0xff]  }
  0xa3   : > { %793 = vmatprep.subr.bf16.mxu0 %v3375_v23  ;;  %3210 = vmatprep.subr.bf16.mxu1 %v3375_v23  ;;  %v4415_v23 = vld [vmem:[%s4178_s24 + $0xe0] ss:$8 sps:$4 sm:$0xff]  }
  0xa6   : > { %794 = vmatpush2.bf16.msra.mxu0 %v3377_v24  ;;  %3226 = vmatpush2.bf16.msra.mxu1 %v3377_v24  ;;  %v3471_v24 = vld [vmem:[%s4164_s30 + $0xb0] ss:$8 sps:$4 sm:$0xff]  }
  0xa7   : > { %795 = vmatprep.subr.bf16.mxu0 %v3378_v25  ;;  %3211 = vmatprep.subr.bf16.mxu1 %v3378_v25  ;;  %v3477_v25 = vld [vmem:[%s4178_s24 + $0x74] ss:$8 sps:$4 sm:$0xff]  }
  0xaa   : > { %796 = vmatpush2.bf16.msra.mxu0 %v3380_v26  ;;  %3227 = vmatpush2.bf16.msra.mxu1 %v3380_v26  ;;  %v3476_v26 = vld [vmem:[%s4164_s30 + $0xa4] ss:$8 sps:$4 sm:$0xff]  }
  0xab   : > { %797 = vmatprep.subr.bf16.mxu0 %v3381_v27  ;;  %3212 = vmatprep.subr.bf16.mxu1 %v3381_v27  ;;  %v4421_v27 = vld [vmem:[%s4178_s24 + $0xf4] ss:$8 sps:$4 sm:$0xff]  }
  0xae   : > { %798 = vmatpush2.bf16.msra.mxu0 %v3383_v28  ;;  %3228 = vmatpush2.bf16.msra.mxu1 %v3383_v28  ;;  %v3474_v28 = vld [vmem:[%s4164_s30 + $0xa0] ss:$8 sps:$4 sm:$0xff]  }
  0xaf   : > { %799 = vmatprep.subr.bf16.mxu0 %v3384_v29  ;;  %3213 = vmatprep.subr.bf16.mxu1 %v3384_v29  ;;  %v3485_v29 = vld [vmem:[%s4164_s30 + $0x94] ss:$8 sps:$4 sm:$0xff]  }
  0xb2   : > { %800 = vmatpush2.bf16.msra.mxu0 %v3386_v30  ;;  %3229 = vmatpush2.bf16.msra.mxu1 %v3386_v30  ;;  %v3481_v30 = vld [vmem:[%s4178_s24 + $0x70] ss:$8 sps:$4 sm:$0xff]  }
  0xb3   : > { %801 = vmatprep.subr.bf16.mxu0 %v3387_v31  ;;  %3214 = vmatprep.subr.bf16.mxu1 %v3387_v31  ;;  %v4429_v31 = vld [vmem:[%s4178_s24 + $0xf0] ss:$8 sps:$4 sm:$0xff]  }
  0xb6   : > { %802 = vmatpush2.bf16.msra.mxu0 %v3389_v32  ;;  %3230 = vmatpush2.bf16.msra.mxu1 %v3389_v32  ;;  %v3483_v32 = vld [vmem:[%s4164_s30 + $0x90] ss:$8 sps:$4 sm:$0xff]  }
  0xb7   : > { %803 = vmatprep.subr.bf16.mxu0 %v3390_v33  ;;  %3215 = vmatprep.subr.bf16.mxu1 %v3390_v33  ;;  %v3488_v33 = vld [vmem:[%s4164_s30 + $0x84] ss:$8 sps:$4 sm:$0xff]  }
  0xba   : > { %804 = vmatpush2.bf16.msra.mxu0 %v3392_v34  ;;  %3231 = vmatpush2.bf16.msra.mxu1 %v3392_v34  ;;  %v3486_v34 = vld [vmem:[%s4164_s30 + $0x80] ss:$8 sps:$4 sm:$0xff]  }
  0xbb   : > { %1158 = vmatprep.subr.bf16.mxu1 %v3401_v36  ;;  %v3491_v36 = vld [vmem:[%s4183_s9 + $0x74] ss:$8 sps:$4 sm:$0xff]  }
  0xbc   : > { %2151 = vmatprep.subr.bf16.mxu0 %v3491_v36 }
  0xbd   : > { %806 = vmatmul.mubr.bf16.vlgmr.msra.gmra.mxu0 %v4293_v35  ;;  %886 = vmatmul.mubr.bf16.vlgmr.msra.gmra.mxu1 %v4297_v37 }
  0xbe   : > { %1159 = vmatpush1.bf16.msra.mxu1 %v3399_v38  ;;  %815 = vmatprep.mubr.bf16.mxu0 %v4302_v40  ;;  %v3489_v38 = vld [vmem:[%s4183_s9 + $0x70] ss:$8 sps:$4 sm:$0xff]  }
  0xbf   : > { %1160 = vmatprep.subr.bf16.mxu1 %v3404_v39  ;;  %895 = vmatprep.mubr.bf16.mxu1 %v4305_v41  ;;  %v3497_v39 = vld [vmem:[%s4183_s9 + $0x54] ss:$8 sps:$4 sm:$0xff]  }
  0xc0   : > { %2152 = vmatpush1.bf16.msra.mxu0 %v3489_v38 }
  0xc2   : > { %1161 = vmatpush1.bf16.msra.mxu1 %v3402_v42  ;;  %v3500_v42 = vld [vmem:[%s4183_s9 + $0x44] ss:$8 sps:$4 sm:$0xff]  }
  0xc3   : > { %1162 = vmatprep.subr.bf16.mxu1 %v3413_v43  ;;  %v3498_v43 = vld [vmem:[%s4183_s9 + $0x40] ss:$8 sps:$4 sm:$0xff]  }
  0xc5   : > { %816 = vmatmul.mubr.bf16.gmra.mxu0 %v4314_v44  ;;  %896 = vmatmul.mubr.bf16.gmra.mxu1 %v4317_v45 }
  0xc6   : > { %1163 = vmatpush1.bf16.msra.mxu1 %v3411_v46  ;;  %825 = vmatprep.mubr.bf16.mxu0 %v4321_v47  ;;  %v3501_v46 = vld [vmem:[%s4183_s9 + $0x30] ss:$8 sps:$4 sm:$0xff]  }
  0xc7   : > { %1164 = vmatprep.subr.bf16.mxu1 %v3416_v48  ;;  %905 = vmatprep.mubr.bf16.mxu1 %v4325_v49  ;;  %v3504_v48 = vld [vmem:[%s4183_s9 + $0x20] ss:$8 sps:$4 sm:$0xff]  }
  0xca   : > { %1165 = vmatpush1.bf16.msra.mxu1 %v3414_v50  ;;  %v3509_v50 = vld [vmem:[%s4183_s9 + $0x14] ss:$8 sps:$4 sm:$0xff]  }
  0xcb   : > { %1166 = vmatprep.subr.bf16.mxu1 %v3425_v51  ;;  %v3507_v51 = vld [vmem:[%s4183_s9 + $0x10] ss:$8 sps:$4 sm:$0xff]  }
  0xcd   : > { %826 = vmatmul.mubr.bf16.gmra.mxu0 %v4334_v52  ;;  %906 = vmatmul.mubr.bf16.gmra.mxu1 %v4337_v53 }
  0xce   : > { %1167 = vmatpush1.bf16.msra.mxu1 %v3423_v54  ;;  %835 = vmatprep.mubr.bf16.mxu0 %v4341_v55  ;;  %v3521_v54 = vld [vmem:[%s4183_s9 + $0xd4] ss:$8 sps:$4 sm:$0xff]  }
  0xcf   : > { %1168 = vmatprep.subr.bf16.mxu1 %v3428_v56  ;;  %915 = vmatprep.mubr.bf16.mxu1 %v4345_v57  ;;  %v3522_v56 = vld [vmem:[%s4183_s9 + $0xc0] ss:$8 sps:$4 sm:$0xff]  }
  0xd2   : > { %1169 = vmatpush1.bf16.msra.mxu1 %v3426_v58  ;;  %v3525_v58 = vld [vmem:[%s4183_s9 + $0xb0] ss:$8 sps:$4 sm:$0xff]  }
  0xd3   : > { %1170 = vmatprep.subr.bf16.mxu1 %v3437_v59  ;;  %v3530_v59 = vld [vmem:[%s4183_s9 + $0xa4] ss:$8 sps:$4 sm:$0xff]  }
  0xd5   : > { %836 = vmatmul.mubr.bf16.gmra.mxu0 %v4354_v60  ;;  %916 = vmatmul.mubr.bf16.gmra.mxu1 %v4357_v61 }
  0xd6   : > { %1171 = vmatpush1.bf16.msra.mxu1 %v3435_v62  ;;  %845 = vmatprep.mubr.bf16.mxu0 %v4361_v63  ;;  %v3531_v62 = vld [vmem:[%s4183_s9 + $0x90] ss:$8 sps:$4 sm:$0xff]  }
  0xd7   : > { %1172 = vmatprep.subr.bf16.mxu1 %v3440_v0  ;;  %925 = vmatprep.mubr.bf16.mxu1 %v4365_v1  ;;  %v3534_v0 = vld [vmem:[%s4183_s9 + $0x80] ss:$8 sps:$4 sm:$0xff]  }
  0xda   : > { %1173 = vmatpush1.bf16.msra.mxu1 %v3438_v2 }
  0xdb   : > { %1174 = vmatprep.subr.bf16.mxu1 %v3449_v3 }
  0xdd   : > { %846 = vmatmul.mubr.bf16.gmra.mxu0 %v4374_v4  ;;  %926 = vmatmul.mubr.bf16.gmra.mxu1 %v4377_v5 }
  0xde   : > { %1175 = vmatpush2.bf16.msra.mxu1 %v3447_v6  ;;  %855 = vmatprep.mubr.bf16.mxu0 %v4381_v7 }
  0xdf   : > { %1176 = vmatprep.subr.bf16.mxu1 %v3452_v8  ;;  %935 = vmatprep.mubr.bf16.mxu1 %v4385_v9 }
  0xe2   : > { %1177 = vmatpush2.bf16.msra.mxu1 %v3450_v10 }
  0xe3   : > { %1178 = vmatprep.subr.bf16.mxu1 %v3461_v11 }
  0xe5   : > { %856 = vmatmul.mubr.bf16.gmra.mxu0 %v4394_v12  ;;  %936 = vmatmul.mubr.bf16.gmra.mxu1 %v4397_v13 }
  0xe6   : > { %1179 = vmatpush2.bf16.msra.mxu1 %v3459_v15  ;;  %865 = vmatprep.mubr.bf16.mxu0 %v4401_v17 }
  0xe7   : > { %1180 = vmatprep.subr.bf16.mxu1 %v3464_v18  ;;  %945 = vmatprep.mubr.bf16.mxu1 %v4405_v19 }
  0xea   : > { %1181 = vmatpush2.bf16.msra.mxu1 %v3462_v20 }
  0xeb   : > { %1182 = vmatprep.subr.bf16.mxu1 %v3473_v21 }
  0xed   : > { %866 = vmatmul.mubr.bf16.gmra.mxu0 %v3469_v22  ;;  %946 = vmatmul.mubr.bf16.gmra.mxu1 %v4415_v23 }
  0xee   : > { %1183 = vmatpush2.bf16.msra.mxu1 %v3471_v24  ;;  %875 = vmatprep.mubr.bf16.mxu0 %v3477_v25 }
  0xef   : > { %1184 = vmatprep.subr.bf16.mxu1 %v3476_v26  ;;  %955 = vmatprep.mubr.bf16.mxu1 %v4421_v27 }
  0xf2   : > { %1185 = vmatpush2.bf16.msra.mxu1 %v3474_v28 }
  0xf3   : > { %1186 = vmatprep.subr.bf16.mxu1 %v3485_v29 }
  0xf5   : > { %876 = vmatmul.mubr.bf16.gmra.mxu0 %v3481_v30  ;;  %956 = vmatmul.mubr.bf16.gmra.mxu1 %v4429_v31 }
  0xf6   : > { %1187 = vmatpush2.bf16.msra.mxu1 %v3483_v32  ;;  %1190 = vmatprep.mubr.bf16.mxu1 %v4266_v14  ;;  %v3494_v14 = vld [vmem:[%s4183_s9 + $0x64] ss:$8 sps:$4 sm:$0xff]  }
  0xf7   : > { %1188 = vmatprep.subr.bf16.mxu1 %v3488_v33  ;;  %2153 = vmatprep.subr.bf16.mxu0 %v3494_v14 }
  0xfa   : > { %1189 = vmatpush2.bf16.msra.mxu1 %v3486_v34 }
  0xfd   : > { %1191 = vmatmul.mubr.bf16.vlgmr.msra.gmra.mxu1 %v4293_v35  ;;  %v3492_v35 = vld [vmem:[%s4183_s9 + $0x60] ss:$8 sps:$4 sm:$0xff]  }
  0xfe   : > { %1200 = vmatprep.mubr.bf16.mxu1 %v4302_v40  ;;  %2154 = vmatpush1.bf16.msra.mxu0 %v3492_v35  ;;  %v3495_v40 = vld [vmem:[%s4183_s9 + $0x50] ss:$8 sps:$4 sm:$0xff]  }
  0xff   : > { %2155 = vmatprep.subr.bf16.mxu0 %v3497_v39 }
 0x102   : > { %2156 = vmatpush1.bf16.msra.mxu0 %v3495_v40 }
 0x103   : > { %2157 = vmatprep.subr.bf16.mxu0 %v3500_v42 }
 0x105   : > { %1201 = vmatmul.mubr.bf16.gmra.mxu1 %v4314_v44  ;;  %v3503_v44 = vld [vmem:[%s4183_s9 + $0x34] ss:$8 sps:$4 sm:$0xff]  }
 0x106   : > { %1210 = vmatprep.mubr.bf16.mxu1 %v4321_v47  ;;  %2158 = vmatpush1.bf16.msra.mxu0 %v3498_v43  ;;  %v3506_v47 = vld [vmem:[%s4183_s9 + $0x24] ss:$8 sps:$4 sm:$0xff]  }
 0x107   : > { %2159 = vmatprep.subr.bf16.mxu0 %v3503_v44 }
 0x10a   : > { %2160 = vmatpush1.bf16.msra.mxu0 %v3501_v46 }
 0x10b   : > { %2161 = vmatprep.subr.bf16.mxu0 %v3506_v47 }
 0x10d   : > { %1211 = vmatmul.mubr.bf16.gmra.mxu1 %v4334_v52  ;;  %v3512_v52 = vld [vmem:[%s4183_s9 + $0x4] ss:$8 sps:$4 sm:$0xff]  }
 0x10e   : > { %1220 = vmatprep.mubr.bf16.mxu1 %v4341_v55  ;;  %2162 = vmatpush1.bf16.msra.mxu0 %v3504_v48  ;;  %v3524_v55 = vld [vmem:[%s4183_s9 + $0xc4] ss:$8 sps:$4 sm:$0xff]  }
 0x10f   : > { %2163 = vmatprep.subr.bf16.mxu0 %v3509_v50 }
 0x112   : > { %2164 = vmatpush1.bf16.msra.mxu0 %v3507_v51 }
 0x113   : > { %2165 = vmatprep.subr.bf16.mxu0 %v3512_v52 }
 0x115   : > { %1221 = vmatmul.mubr.bf16.gmra.mxu1 %v4354_v60  ;;  %v3528_v60 = vld [vmem:[%s4183_s9 + $0xa0] ss:$8 sps:$4 sm:$0xff]  }
 0x116   : > { %1230 = vmatprep.mubr.bf16.mxu1 %v4361_v63  ;;  %v3536_v63 = vld [vmem:[%s4183_s9 + $0x84] ss:$8 sps:$4 sm:$0xff]  }
 0x11d   : > { %1231 = vmatmul.mubr.bf16.gmra.mxu1 %v4374_v4 }
 0x11e   : > { %1240 = vmatprep.mubr.bf16.mxu1 %v4381_v7 }
 0x125   : > { %1241 = vmatmul.mubr.bf16.gmra.mxu1 %v4394_v12 }
 0x126   : > { %1250 = vmatprep.mubr.bf16.mxu1 %v4401_v17 }
 0x12d   : > { %1251 = vmatmul.mubr.bf16.gmra.mxu1 %v3469_v22 }
 0x12e   : > { %1260 = vmatprep.mubr.bf16.mxu1 %v3477_v25 }
 0x135   : > { %1261 = vmatmul.mubr.bf16.gmra.mxu1 %v3481_v30 }
 0x136   : > { %1270 = vmatprep.mubr.bf16.mxu1 %v4270_v16  ;;  %v3510_v16 = vld [vmem:[%s4183_s9] ss:$8 sps:$4 sm:$0xff]  }
 0x137   : > { %2166 = vmatpush1.bf16.msra.mxu0 %v3510_v16 }
 0x13d   : > { %1271 = vmatmul.mubr.bf16.gmra.mxu1 %v4297_v37  ;;  %v3515_v37 = vld [vmem:[%s4183_s9 + $0xf4] ss:$8 sps:$4 sm:$0xff]  }
 0x13e   : > { %1280 = vmatprep.mubr.bf16.mxu1 %v4305_v41  ;;  %v3513_v41 = vld [vmem:[%s4183_s9 + $0xf0] ss:$8 sps:$4 sm:$0xff]   ;;  %2167 = vmatprep.subr.bf16.mxu0 %v3515_v37 }
 0x13f   : > { %2168 = vmatpush2.bf16.msra.mxu0 %v3513_v41 }
 0x145   : > { %1281 = vmatmul.mubr.bf16.gmra.mxu1 %v4317_v45  ;;  %v3518_v45 = vld [vmem:[%s4183_s9 + $0xe4] ss:$8 sps:$4 sm:$0xff]  }
 0x146   : > { %1290 = vmatprep.mubr.bf16.mxu1 %v4325_v49  ;;  %v3516_v49 = vld [vmem:[%s4183_s9 + $0xe0] ss:$8 sps:$4 sm:$0xff]   ;;  %2169 = vmatprep.subr.bf16.mxu0 %v3518_v45 }
 0x147   : > { %2170 = vmatpush2.bf16.msra.mxu0 %v3516_v49 }
 0x148   : > { %2171 = vmatprep.subr.bf16.mxu0 %v3521_v54 }
 0x14d   : > { %1291 = vmatmul.mubr.bf16.gmra.mxu1 %v4337_v53  ;;  %v3519_v53 = vld [vmem:[%s4183_s9 + $0xd0] ss:$8 sps:$4 sm:$0xff]  }
 0x14e   : > { %1300 = vmatprep.mubr.bf16.mxu1 %v4345_v57  ;;  %2172 = vmatpush2.bf16.msra.mxu0 %v3519_v53  ;;  %v3527_v57 = vld [vmem:[%s4183_s9 + $0xb4] ss:$8 sps:$4 sm:$0xff]  }
 0x14f   : > { %2173 = vmatprep.subr.bf16.mxu0 %v3524_v55 }
 0x152   : > { %2174 = vmatpush2.bf16.msra.mxu0 %v3522_v56 }
 0x153   : > { %2175 = vmatprep.subr.bf16.mxu0 %v3527_v57 }
 0x155   : > { %1301 = vmatmul.mubr.bf16.gmra.mxu1 %v4357_v61  ;;  %v3533_v61 = vld [vmem:[%s4183_s9 + $0x94] ss:$8 sps:$4 sm:$0xff]  }
 0x156   : > { %1310 = vmatprep.mubr.bf16.mxu1 %v4365_v1  ;;  %2176 = vmatpush2.bf16.msra.mxu0 %v3525_v58 }
 0x157   : > { %2177 = vmatprep.subr.bf16.mxu0 %v3530_v59 }
 0x15a   : > { %2178 = vmatpush2.bf16.msra.mxu0 %v3528_v60 }
 0x15b   : > { %2179 = vmatprep.subr.bf16.mxu0 %v3533_v61 }
 0x15d   : > { %1311 = vmatmul.mubr.bf16.gmra.mxu1 %v4377_v5 }
 0x15e   : > { %1320 = vmatprep.mubr.bf16.mxu1 %v4385_v9  ;;  %2180 = vmatpush2.bf16.msra.mxu0 %v3531_v62 }
 0x15f   : > { %2181 = vmatprep.subr.bf16.mxu0 %v3536_v63 }
 0x162   : > { %2182 = vmatpush2.bf16.msra.mxu0 %v3534_v0 }
 0x165   : > { %1321 = vmatmul.mubr.bf16.gmra.mxu1 %v4397_v13 }
 0x166   : > { %1330 = vmatprep.mubr.bf16.mxu1 %v4405_v19 }
 0x16d   : > { %1331 = vmatmul.mubr.bf16.gmra.mxu1 %v4415_v23 }
 0x16e   : > { %1340 = vmatprep.mubr.bf16.mxu1 %v4421_v27 }
 0x175   : > { %1341 = vmatmul.mubr.bf16.gmra.mxu1 %v4429_v31 }
 0x17d   : > { %v4496_v1 = vpop.f32.mrf.mxu0  ;;  %v4498_v2 = vpop.f32.mrf.mxu1 }
 0x17e   : > { %v3027_v26 = vmul.f32 -1.442695, %v4496_v1 }
 0x17f   : > { %v4500_v3 = vpop.f32.mrf.mxu0  ;;  %v4502_v4 = vpop.f32.mrf.mxu1 }
 0x180   : > { %v3028_v28 = vmul.f32 -1.442695, %v4500_v3  ;;  %3537 = vpow2.f32 %v3027_v26 }
 0x181   : > { %v4504_v5 = vpop.f32.mrf.mxu0  ;;  %v4506_v6 = vpop.f32.mrf.mxu1 }
 0x182   : > { %v3029_v31 = vmul.f32 -1.442695, %v4504_v5  ;;  %3539 = vpow2.f32 %v3028_v28 }
 0x183   : > { %v4508_v7 = vpop.f32.mrf.mxu0  ;;  %v4510_v8 = vpop.f32.mrf.mxu1 }
 0x184   : > { %v3030_v33 = vmul.f32 -1.442695, %v4508_v7  ;;  %3541 = vpow2.f32 %v3029_v31 }
 0x185   : > { %v4512_v9 = vpop.f32.mrf.mxu0  ;;  %v4514_v10 = vpop.f32.mrf.mxu1 }
 0x186   : > { %3543 = vpow2.f32 %v3030_v33  ;;  %v3031_v44 = vmul.f32 -1.442695, %v4512_v9 }
 0x187   : > { %v4516_v11 = vpop.f32.mrf.mxu0  ;;  %v4518_v12 = vpop.f32.mrf.mxu1 }
 0x188   : > { %v3032_v39 = vmul.f32 -1.442695, %v4516_v11 }
 0x189   : > { %v4520_v13 = vpop.f32.mrf.mxu0  ;;  %v4522_v15 = vpop.f32.mrf.mxu1 }
 0x18a   : > { %v3033_v40 = vmul.f32 -1.442695, %v4520_v13  ;;  %3545 = vpow2.f32 %v3032_v39 }
 0x18b   : > { %v4524_v17 = vpop.f32.mrf.mxu0  ;;  %v4526_v18 = vpop.f32.mrf.mxu1 }
 0x18c   : > { %v3034_v43 = vmul.f32 -1.442695, %v4524_v17  ;;  %3547 = vpow2.f32 %v3033_v40 }
 0x18d   : > { %v4528_v19 = vpop.f32.mrf.mxu0  ;;  %v4530_v20 = vpop.f32.mrf.mxu1 }
 0x18e   : > { %v3538_v50 = vpop.eup %3537  ;;  %3549 = vpow2.f32 %v3034_v43  ;;  %v3035_v57 = vmul.f32 -1.442695, %v4528_v19 }
 0x18f   : > { %v4532_v21 = vpop.f32.mrf.mxu0  ;;  %v4534_v22 = vpop.f32.mrf.mxu1  ;;  %3551 = vpow2.f32 %v3031_v44  ;;  %v1543_v54 = vadd.f32 1.0, %v3538_v50 }
 0x190   : > { %v3036_v51 = vmul.f32 -1.442695, %v4532_v21  ;;  %v3540_v52 = vpop.eup %3539 }
 0x191   : > { %v4536_v23 = vpop.f32.mrf.mxu1  ;;  %v4538_v24 = vpop.f32.mrf.mxu0  ;;  %v1544_v55 = vadd.f32 1.0, %v3540_v52 }
 0x192   : > { %v3037_v16 = vmul.f32 -1.442695, %v4538_v24  ;;  %v3542_v49 = vpop.eup %3541  ;;  %3553 = vpow2.f32 %v3036_v51 }
 0x193   : > { %v4540_v25 = vpop.f32.mrf.mxu1  ;;  %v4546_v29 = vpop.f32.mrf.mxu0  ;;  %v1545_v60 = vadd.f32 1.0, %v3542_v49 }
 0x194   : > { %v3038_v45 = vmul.f32 -1.442695, %v4546_v29  ;;  %v3544_v56 = vpop.eup %3543  ;;  %3555 = vpow2.f32 %v3037_v16 }
 0x195   : > { %v4543_v27 = vpop.f32.mrf.mxu1  ;;  %v4554_v34 = vpop.f32.mrf.mxu0  ;;  %v1546_v63 = vadd.f32 1.0, %v3544_v56 }
 0x196   : > { %3557 = vpow2.f32 %v3038_v45  ;;  %v3039_v44 = vmul.f32 -1.442695, %v4554_v34 }
 0x197   : > { %v4548_v30 = vpop.f32.mrf.mxu1  ;;  %v4560_v14 = vpop.f32.mrf.mxu0  ;;  %3559 = vrcp.f32 %v1543_v54 }
 0x198   : > { %v3040_v61 = vmul.f32 -1.442695, %v4560_v14  ;;  %3561 = vrcp.f32 %v1544_v55  ;;  %v3546_v33 = vpop.eup %3545 }
 0x199   : > { %v4551_v32 = vpop.f32.mrf.mxu1  ;;  %v4570_v46 = vpop.f32.mrf.mxu0  ;;  %3563 = vpow2.f32 %v3035_v57  ;;  %v1548_v16 = vadd.f32 1.0, %v3546_v33 }
 0x19a   : > { %v3041_v0 = vmul.f32 -1.442695, %v4570_v46  ;;  %3565 = vrcp.f32 %v1545_v60  ;;  %v3548_v40 = vpop.eup %3547 }
 0x19b   : > { %v4556_v36 = vpop.f32.mrf.mxu1  ;;  %v4578_v37 = vpop.f32.mrf.mxu0  ;;  %3567 = vpow2.f32 %v3040_v61  ;;  %v1549_v45 = vadd.f32 1.0, %v3548_v40 }
 0x19c   : > { %v3042_v31 = vmul.f32 -1.442695, %v4578_v37  ;;  %3569 = vrcp.f32 %v1546_v63  ;;  %v3550_v43 = vpop.eup %3549  ;;  %v3059_v63 = vmul.f32 -1.442695, %v4498_v2 }
 0x19d   : > { %v4558_v38 = vpop.f32.mrf.mxu1  ;;  %v4586_v58 = vpop.f32.mrf.mxu0  ;;  %3571 = vpow2.f32 %v3041_v0  ;;  %v1550_v54 = vadd.f32 1.0, %v3550_v43 }
 0x19e   : > { %5022 = vst [vmem:[#allocation20_spill] sm:$0xff] %v4558_v38  ;;  %v3552_v52 = vpop.eup %3551  ;;  %3573 = vpow2.f32 %v3042_v31 }
 0x19f   : > { %v4562_v35 = vpop.f32.mrf.mxu1  ;;  %v4594_v26 = vpop.f32.mrf.mxu0  ;;  %v1547_v56 = vadd.f32 1.0, %v3552_v52  ;;  %3575 = vpow2.f32 %v3039_v44 }
 0x1a0   : > { %v3554_v55 = vpop.eup %3553  ;;  %3577 = vrcp.f32 %v1548_v16 }
 0x1a1   : > { %v4566_v42 = vpop.f32.mrf.mxu1  ;;  %v4602_v50 = vpop.f32.mrf.mxu0  ;;  %3579 = vrcp.f32 %v1549_v45  ;;  %v1552_v40 = vadd.f32 1.0, %v3554_v55 }
 0x1a2   : > { %5023 = vst [vmem:[#allocation21_spill] sm:$0xff] %v4566_v42  ;;  %v3556_v61 = vpop.eup %3555  ;;  %3581 = vrcp.f32 %v1550_v54  ;;  %v3044_v54 = vmul.f32 -1.442695, %v4594_v26 }
 0x1a3   : > { %v4572_v47 = vpop.f32.mrf.mxu1  ;;  %v4608_v57 = vpop.f32.mrf.mxu0  ;;  %3583 = vrcp.f32 %v1547_v56  ;;  %v1553_v44 = vadd.f32 1.0, %v3556_v61 }
 0x1a4   : > { %5024 = vst [vmem:[#allocation22_spill] sm:$0xff] %v4572_v47  ;;  %v3558_v0 = vpop.eup %3557  ;;  %3585 = vpow2.f32 %v3059_v63  ;;  %v3045_v63 = vmul.f32 -1.442695, %v4602_v50 }
 0x1a5   : > { %v4574_v48 = vpop.f32.mrf.mxu1  ;;  %v3560_v33 = vpop.eup %3559 }
 0x1a6   : > { %5025 = vst [vmem:[#allocation23_spill] sm:$0xff] %v4574_v48  ;;  %v3562_v43 = vpop.eup %3561  ;;  %v4616_v52 = vpop.f32.mrf.mxu0  ;;  %v3043_v48 = vmul.f32 -1.442695, %v4586_v58 }
 0x1a7   : > { %v4580_v41 = vpop.f32.mrf.mxu1 }
 0x1a8   : > { %5026 = vst [vmem:[#allocation24_spill] sm:$0xff] %v4580_v41  ;;  %v4622_v56 = vpop.f32.mrf.mxu0 }
 0x1a9   : > { %v4583_v53 = vpop.f32.mrf.mxu1 }
 0x1aa   : > { %5027 = vst [vmem:[#allocation25_spill] sm:$0xff] %v4583_v53 }
 0x1ab   : > { %v4588_v59 = vpop.f32.mrf.mxu1 }
 0x1ac   : > { %5028 = vst [vmem:[#allocation26_spill] sm:$0xff] %v4588_v59 }
 0x1ad   : > { %v4591_v62 = vpop.f32.mrf.mxu1 }
 0x1ae   : > { %5029 = vst [vmem:[#allocation27_spill] sm:$0xff] %v4591_v62  ;;  %v3060_v62 = vmul.f32 -1.442695, %v4502_v4 }
 0x1af   : > { %v4596_v28 = vpop.f32.mrf.mxu1 }
 0x1b0   : > { %5030 = vst [vmem:[#allocation28_spill] sm:$0xff] %v4596_v28  ;;  %3587 = vpow2.f32 %v3060_v62 }
 0x1b1   : > { %v4599_v39 = vpop.f32.mrf.mxu1  ;;  %3589 = vrcp.f32 %v1552_v40  ;;  %v1736_v40 = vmul.f32 %v3562_v43, %v4500_v3  ;;  %v3047_v3 = vmul.f32 -1.442695, %v4616_v52 }
 0x1b2   : > { %5031 = vst [vmem:[#allocation29_spill] sm:$0xff] %v4599_v39  ;;  %v1554_v39 = vadd.f32 1.0, %v3558_v0  ;;  %3591 = vrcp.f32 %v1553_v44  ;;  %v1735_v44 = vmul.f32 %v3560_v33, %v4496_v1  ;;  %v3048_v1 = vmul.f32 -1.442695, %v4622_v56 }
 0x1b3   : > { %v4604_v51 = vpop.f32.mrf.mxu1 }
 0x1b4   : > { %5032 = vst [vmem:[#allocation30_spill] sm:$0xff] %v4604_v51  ;;  %3593 = vrcp.f32 %v1554_v39  ;;  %v4630_v39 = vpop.f32.mrf.mxu0 }
 0x1b5   : > { %v4606_v49 = vpop.f32.mrf.mxu1 }
 0x1b6   : > { %5033 = vst [vmem:[#allocation31_spill] sm:$0xff] %v4606_v49 }
 0x1b7   : > { %v4610_v60 = vpop.f32.mrf.mxu1 }
 0x1b8   : > { %5034 = vst [vmem:[#allocation32_spill] sm:$0xff] %v4610_v60  ;;  %v3564_v60 = vpop.eup %3563  ;;  %3595 = vpow2.f32 %v3043_v48 }
 0x1b9   : > { %v4614_v31 = vpop.f32.mrf.mxu1  ;;  %v3566_v16 = vpop.eup %3565  ;;  %3597 = vpow2.f32 %v3044_v54 }
 0x1ba   : > { %5035 = vst [vmem:[#allocation33_spill] sm:$0xff] %v4614_v31  ;;  %v3568_v28 = vpop.eup %3567  ;;  %v1551_v31 = vadd.f32 1.0, %v3564_v60  ;;  %v1737_v62 = vmul.f32 %v3566_v16, %v4504_v5  ;;  %v3046_v60 = vmul.f32 -1.442695, %v4608_v57 }
 0x1bb   : > { %v4618_v49 = vpop.f32.mrf.mxu1  ;;  %v3570_v55 = vpop.eup %3569 }
 0x1bc   : > { %5036 = vst [vmem:[#allocation34_spill] sm:$0xff] %v4618_v49  ;;  %v3572_v53 = vpop.eup %3571  ;;  %v1556_v49 = vadd.f32 1.0, %v3568_v28  ;;  %v1738_v38 = vmul.f32 %v3570_v55, %v4508_v7  ;;  %3599 = vrcp.f32 %v1551_v31 }
 0x1bd   : > { %v1192_v45 = vpop.f32.mrf.mxu1  ;;  %v3574_v0 = vpop.eup %3573  ;;  %v1557_v41 = vadd.f32 1.0, %v3572_v53  ;;  %3601 = vpow2.f32 %v3045_v63 }
 0x1be   : > { %v3576_v47 = vpop.eup %3575  ;;  %v1558_v5 = vadd.f32 1.0, %v3574_v0  ;;  %3603 = vrcp.f32 %v1556_v49  ;;  %v1799_v7 = vmul.f32 %v1735_v44, %v1192_v45 }
 0x1bf   : > { %v1194_v61 = vpop.f32.mrf.mxu1  ;;  %v3578_v16 = vpop.eup %3577  ;;  %3605 = vpow2.f32 %v3046_v60  ;;  %v1555_v33 = vadd.f32 1.0, %v3576_v47 }
 0x1c0   : > { %v1800_v48 = vmul.f32 %v1736_v40, %v1194_v61  ;;  %v3580_v54 = vpop.eup %3579  ;;  %3607 = vrcp.f32 %v1557_v41  ;;  %v1740_v47 = vmul.f32 %v3578_v16, %v4516_v11  ;;  %v3061_v40 = vmul.f32 -1.442695, %v4506_v6 }
 0x1c1   : > { %v1196_v51 = vpop.f32.mrf.mxu1  ;;  %v3582_v31 = vpop.eup %3581  ;;  %3609 = vrcp.f32 %v1558_v5  ;;  %v1741_v49 = vmul.f32 %v3580_v54, %v4520_v13 }
 0x1c2   : > { %v1801_v42 = vmul.f32 %v1737_v62, %v1196_v51  ;;  %v4634_v51 = vpop.f32.mrf.mxu0  ;;  %v3584_v61 = vpop.eup %3583  ;;  %3611 = vpow2.f32 %v3047_v3  ;;  %v1742_v41 = vmul.f32 %v3582_v31, %v4524_v17  ;;  %v3062_v17 = vmul.f32 -1.442695, %v4510_v8 }
 0x1c3   : > { %v1198_v59 = vpop.f32.mrf.mxu1  ;;  %3613 = vpow2.f32 %v3048_v1  ;;  %v1739_v60 = vmul.f32 %v3584_v61, %v4512_v9 }
 0x1c4   : > { %v1802_v28 = vmul.f32 %v1738_v38, %v1198_v59  ;;  %v1927_v55 = vpack.c.bf16 %v1801_v42, %v1799_v7  ;;  %v3049_v38 = vmul.f32 -1.442695, %v4630_v39  ;;  %v4637_v59 = vpop.eup %3585  ;;  %v3050_v42 = vmul.f32 -1.442695, %v4634_v51  ;;  %v4647_v44 = vpop.f32.mrf.mxu0 }
 0x1c5   : > { %v1202_v43 = vpop.f32.mrf.mxu1  ;;  %v4640_v0 = vpop.eup %3587  ;;  %3615 = vrcp.f32 %v1555_v33 }
 0x1c6   : > { %v1928_v53 = vpack.c.bf16 %v1802_v28, %v1800_v48  ;;  %v3590_v62 = vpop.eup %3589  ;;  %3617 = vpow2.f32 %v3049_v38  ;;  %v1803_v16 = vmul.f32 %v1739_v60, %v1202_v43  ;;  %v4650_v9 = vpop.f32.mrf.mxu0 }
 0x1c7   : > { %v1204_v63 = vpop.f32.mrf.mxu1  ;;  %v3592_v48 = vpop.eup %3591  ;;  %3619 = vpow2.f32 %v3050_v42 }
 0x1c8   : > { %2183 = vmatprep.mubr.bf16.mxu0 %v1928_v53  ;;  %v1804_v28 = vmul.f32 %v1740_v47, %v1204_v63  ;;  %v3594_v11 = vpop.eup %3593  ;;  %3621 = vpow2.f32 %v3061_v40  ;;  %v1745_v63 = vmul.f32 %v3592_v48, %v4538_v24  ;;  %v3063_v47 = vmul.f32 -1.442695, %v4514_v10 }
 0x1c9   : > { %v1206_v45 = vpop.f32.mrf.mxu1  ;;  %2184 = vmatmul.mubr.bf16.vlgmr.msra.gmra.mxu0 %v1927_v55  ;;  %v3596_v54 = vpop.eup %3595  ;;  %3623 = vpow2.f32 %v3062_v17  ;;  %v1746_v42 = vmul.f32 %v3594_v11, %v4546_v29 }
 0x1ca   : > { %v1805_v13 = vmul.f32 %v1741_v49, %v1206_v45  ;;  %v3598_v53 = vpop.eup %3597  ;;  %v1559_v49 = vadd.f32 1.0, %v3596_v54 }
 0x1cb   : > { %v1208_v5 = vpop.f32.mrf.mxu1  ;;  %v3600_v55 = vpop.eup %3599  ;;  %v1560_v61 = vadd.f32 1.0, %v3598_v53  ;;  %v3066_v53 = vmul.f32 -1.442695, %v4526_v18 }
 0x1cc   : > { %v1806_v3 = vmul.f32 %v1742_v41, %v1208_v5  ;;  %v1929_v31 = vpack.c.bf16 %v1805_v13, %v1803_v16  ;;  %v3602_v38 = vpop.eup %3601  ;;  %v1744_v41 = vmul.f32 %v3590_v62, %v4532_v21  ;;  %v3064_v13 = vmul.f32 -1.442695, %v4518_v12 }
 0x1cd   : > { %v1212_v7 = vpop.f32.mrf.mxu1  ;;  %v3604_v43 = vpop.eup %3603  ;;  %v1561_v40 = vadd.f32 1.0, %v3602_v38  ;;  %v1743_v5 = vmul.f32 %v3600_v55, %v4528_v19  ;;  %3625 = vrcp.f32 %v1560_v61  ;;  %v3065_v21 = vmul.f32 -1.442695, %v4522_v15 }
 0x1ce   : > { %v1930_v1 = vpack.c.bf16 %v1806_v3, %v1804_v28  ;;  %v3606_v60 = vpop.eup %3605  ;;  %v4658_v28 = vpop.f32.mrf.mxu0 }
 0x1cf   : > { %v1214_v33 = vpop.f32.mrf.mxu1  ;;  %v3608_v3 = vpop.eup %3607  ;;  %3627 = vrcp.f32 %v1561_v40  ;;  %v1562_v17 = vadd.f32 1.0, %v3606_v60  ;;  %v1807_v29 = vmul.f32 %v1743_v5, %v1212_v7 }
 0x1d0   : > { %2193 = vmatprep.mubr.bf16.mxu0 %v1930_v1  ;;  %v1808_v16 = vmul.f32 %v1744_v41, %v1214_v33  ;;  %v3610_v1 = vpop.eup %3609  ;;  %3629 = vrcp.f32 %v1559_v49  ;;  %v4662_v55 = vpop.f32.mrf.mxu0  ;;  %v1575_v49 = vadd.f32 1.0, %v4637_v59  ;;  %v1749_v7 = vmul.f32 %v3608_v3, %v4570_v46 }
 0x1d1   : > { %v1216_v45 = vpop.f32.mrf.mxu1  ;;  %2194 = vmatmul.mubr.bf16.gmra.mxu0 %v1929_v31  ;;  %v3612_v11 = vpop.eup %3611  ;;  %3631 = vrcp.f32 %v1562_v17  ;;  %v1750_v40 = vmul.f32 %v3610_v1, %v4578_v37 }
 0x1d2   : > { %v1809_v24 = vmul.f32 %v1745_v63, %v1216_v45  ;;  %v3614_v31 = vpop.eup %3613  ;;  %3633 = vpow2.f32 %v3063_v47  ;;  %v1563_v41 = vadd.f32 1.0, %v3612_v11  ;;  %v1748_v47 = vmul.f32 %v3604_v43, %v4560_v14 }
 0x1d3   : > { %v1218_v48 = vpop.f32.mrf.mxu1  ;;  %v3616_v63 = vpop.eup %3615  ;;  %3635 = vpow2.f32 %v3064_v13  ;;  %v1564_v33 = vadd.f32 1.0, %v3614_v31  ;;  %v1576_v13 = vadd.f32 1.0, %v4640_v0  ;;  %v3051_v14 = vmul.f32 -1.442695, %v4647_v44 }
 0x1d4   : > { %v1810_v54 = vmul.f32 %v1746_v42, %v1218_v48  ;;  %v1931_v61 = vpack.c.bf16 %v1809_v24, %v1807_v29  ;;  %v3618_v45 = vpop.eup %3617  ;;  %3637 = vpow2.f32 %v3065_v21  ;;  %v1747_v24 = vmul.f32 %v3616_v63, %v4554_v34  ;;  %v4670_v48 = vpop.f32.mrf.mxu0 }
 0x1d5   : > { %v1222_v62 = vpop.f32.mrf.mxu1  ;;  %3639 = vpow2.f32 %v3066_v53  ;;  %v1565_v60 = vadd.f32 1.0, %v3618_v45  ;;  %v3620_v5 = vpop.eup %3619  ;;  %v3052_v0 = vmul.f32 -1.442695, %v4650_v9  ;;  %v3053_v31 = vmul.f32 -1.442695, %v4658_v28 }
 0x1d6   : > { %v1932_v19 = vpack.c.bf16 %v1810_v54, %v1808_v16  ;;  %3641 = vrcp.f32 %v1564_v33  ;;  %v3622_v46 = vpop.eup %3621  ;;  %v1566_v3 = vadd.f32 1.0, %v3620_v5  ;;  %v1811_v37 = vmul.f32 %v1747_v24, %v1222_v62  ;;  %v4674_v29 = vpop.f32.mrf.mxu0 }
 0x1d7   : > { %v1224_v38 = vpop.f32.mrf.mxu1  ;;  %3643 = vrcp.f32 %v1565_v60  ;;  %v3624_v1 = vpop.eup %3623  ;;  %v1577_v21 = vadd.f32 1.0, %v3622_v46  ;;  %v3054_v33 = vmul.f32 -1.442695, %v4662_v55 }
 0x1d8   : > { %2203 = vmatprep.mubr.bf16.mxu0 %v1932_v19  ;;  %v1812_v16 = vmul.f32 %v1748_v47, %v1224_v38  ;;  %3645 = vrcp.f32 %v1563_v41  ;;  %v1578_v38 = vadd.f32 1.0, %v3624_v1  ;;  %v4680_v41 = vpop.f32.mrf.mxu0 }
 0x1d9   : > { %v1226_v42 = vpop.f32.mrf.mxu1  ;;  %2204 = vmatmul.mubr.bf16.gmra.mxu0 %v1931_v61  ;;  %3647 = vrcp.f32 %v1566_v3  ;;  %v3056_v3 = vmul.f32 -1.442695, %v4674_v29 }
 0x1da   : > { %v1813_v59 = vmul.f32 %v1749_v7, %v1226_v42  ;;  %3649 = vrcp.f32 %v1575_v49  ;;  %v3626_v19 = vpop.eup %3625  ;;  %v3067_v49 = vmul.f32 -1.442695, %v4530_v20 }
 0x1db   : > { %v1228_v17 = vpop.f32.mrf.mxu1  ;;  %3651 = vrcp.f32 %v1576_v13  ;;  %v1752_v60 = vmul.f32 %v3626_v19, %v4594_v26 }
 0x1dc   : > { %v1814_v54 = vmul.f32 %v1750_v40, %v1228_v17  ;;  %v1933_v11 = vpack.c.bf16 %v1813_v59, %v1811_v37  ;;  %v3628_v61 = vpop.eup %3627  ;;  %3653 = vpow2.f32 %v3051_v14  ;;  %v3068_v40 = vmul.f32 -1.442695, %v4534_v22  ;;  %v4697_v14 = vpop.f32.mrf.mxu0 }
 0x1dd   : > { %v1232_v43 = vpop.f32.mrf.mxu1  ;;  %v3630_v63 = vpop.eup %3629  ;;  %3655 = vpow2.f32 %v3052_v0  ;;  %v1753_v7 = vmul.f32 %v3628_v61, %v4602_v50  ;;  %v3055_v59 = vmul.f32 -1.442695, %v4670_v48  ;;  %v3057_v0 = vmul.f32 -1.442695, %v4680_v41 }
 0x1de   : > { %v1934_v34 = vpack.c.bf16 %v1814_v54, %v1812_v16  ;;  %v3632_v45 = vpop.eup %3631  ;;  %3657 = vrcp.f32 %v1577_v21  ;;  %v1751_v24 = vmul.f32 %v3630_v63, %v4586_v58  ;;  %v3058_v61 = vmul.f32 -1.442695, %v4697_v14 }
 0x1df   : > { %v1234_v53 = vpop.f32.mrf.mxu1  ;;  %v4682_v47 = vpop.eup %3633  ;;  %v1754_v5 = vmul.f32 %v3632_v45, %v4608_v57  ;;  %3659 = vpow2.f32 %v3053_v31  ;;  %v3069_v57 = vmul.f32 -1.442695, %v4536_v23  ;;  %v3072_v45 = vmul.f32 -1.442695, %v4548_v30 }
 0x1e0   : > { %2213 = vmatprep.mubr.bf16.mxu0 %v1934_v34  ;;  %v4687_v13 = vpop.eup %3635  ;;  %3661 = vrcp.f32 %v1578_v38  ;;  %v1816_v16 = vmul.f32 %v1752_v60, %v1234_v53  ;;  %v1815_v37 = vmul.f32 %v1751_v24, %v1232_v43  ;;  %v3071_v43 = vmul.f32 -1.442695, %v4543_v27 }
 0x1e1   : > { %v1236_v62 = vpop.f32.mrf.mxu1  ;;  %2214 = vmatmul.mubr.bf16.gmra.mxu0 %v1933_v11  ;;  %v4691_v46 = vpop.eup %3637  ;;  %3663 = vpow2.f32 %v3054_v33  ;;  %v3070_v11 = vmul.f32 -1.442695, %v4540_v25 }
 0x1e2   : > { %v1817_v50 = vmul.f32 %v1753_v7, %v1236_v62  ;;  %v4694_v26 = vpop.eup %3639  ;;  %3665 = vpow2.f32 %v3067_v49 }
 0x1e3   : > { %v1238_v42 = vpop.f32.mrf.mxu1  ;;  %v3642_v1 = vpop.eup %3641  ;;  %3667 = vpow2.f32 %v3068_v40  ;;  %v3073_v40 = vmul.f32 -1.442695, %v4551_v32 }
 0x1e4   : > { %v1818_v54 = vmul.f32 %v1754_v5, %v1238_v42  ;;  %v3644_v21 = vpop.eup %3643  ;;  %3669 = vpow2.f32 %v3055_v59  ;;  %v1935_v53 = vpack.c.bf16 %v1817_v50, %v1815_v37  ;;  %v1756_v49 = vmul.f32 %v3642_v1, %v4622_v56 }
 0x1e5   : > { %v1242_v17 = vpop.f32.mrf.mxu1  ;;  %v3646_v31 = vpop.eup %3645  ;;  %3671 = vpow2.f32 %v3056_v3  ;;  %v1757_v62 = vmul.f32 %v3644_v21, %v4630_v39  ;;  %v3074_v59 = vmul.f32 -1.442695, %v4556_v36 }
 0x1e6   : > { %v1936_v34 = vpack.c.bf16 %v1818_v54, %v1816_v16  ;;  %v3648_v38 = vpop.eup %3647  ;;  %3673 = vpow2.f32 %v3069_v57  ;;  %v1755_v60 = vmul.f32 %v3646_v31, %v4616_v52  ;;  %v1581_v31 = vadd.f32 1.0, %v4691_v46 }
 0x1e7   : > { %v1244_v58 = vpop.f32.mrf.mxu1  ;;  %v4704_v33 = vpop.eup %3649  ;;  %v1758_v7 = vmul.f32 %v3648_v38, %v4634_v51  ;;  %3675 = vpow2.f32 %v3057_v0 }
 0x1e8   : > { %2223 = vmatprep.mubr.bf16.mxu0 %v1936_v34  ;;  %v4709_v42 = vpop.eup %3651  ;;  %3677 = vpow2.f32 %v3070_v11  ;;  %v1820_v50 = vmul.f32 %v1756_v49, %v1244_v58  ;;  %v1819_v51 = vmul.f32 %v1755_v60, %v1242_v17  ;;  %v1579_v17 = vadd.f32 1.0, %v4682_v47 }
 0x1e9   : > { %v1246_v19 = vpop.f32.mrf.mxu1  ;;  %2224 = vmatmul.mubr.bf16.gmra.mxu0 %v1935_v53  ;;  %v3654_v24 = vpop.eup %3653  ;;  %3679 = vpow2.f32 %v3058_v61 }
 0x1ea   : > { %v1821_v5 = vmul.f32 %v1757_v62, %v1246_v19  ;;  %v3656_v56 = vpop.eup %3655  ;;  %3681 = vpow2.f32 %v3071_v43  ;;  %v1567_v1 = vadd.f32 1.0, %v3654_v24  ;;  %v1580_v43 = vadd.f32 1.0, %v4687_v13 }
 0x1eb   : > { %v1248_v63 = vpop.f32.mrf.mxu1  ;;  %v4718_v54 = vpop.eup %3657  ;;  %3683 = vpow2.f32 %v3072_v45  ;;  %v1568_v57 = vadd.f32 1.0, %v3656_v56  ;;  %v1582_v45 = vadd.f32 1.0, %v4694_v26 }
 0x1ec   : > { %v1822_v3 = vmul.f32 %v1758_v7, %v1248_v63  ;;  %v3660_v52 = vpop.eup %3659  ;;  %3685 = vpow2.f32 %v3073_v40  ;;  %v1937_v0 = vpack.c.bf16 %v1821_v5, %v1819_v51 }
 0x1ed   : > { %v4713_v39 = vpop.f32.mrf.mxu1  ;;  %v4722_v21 = vpop.eup %3661  ;;  %3687 = vpow2.f32 %v3074_v59  ;;  %v1569_v58 = vadd.f32 1.0, %v3660_v52 }
 0x1ee   : > { %v1938_v37 = vpack.c.bf16 %v1822_v3, %v1820_v50  ;;  %v3664_v11 = vpop.eup %3663  ;;  %3689 = vrcp.f32 %v1568_v57 }
 0x1ef   : > { %v4716_v16 = vpop.f32.mrf.mxu1  ;;  %v3666_v19 = vpop.eup %3665  ;;  %3691 = vrcp.f32 %v1569_v58  ;;  %v1570_v61 = vadd.f32 1.0, %v3664_v11 }
 0x1f0   : > { %2233 = vmatprep.mubr.bf16.mxu0 %v1938_v37  ;;  %v3668_v38 = vpop.eup %3667  ;;  %3693 = vrcp.f32 %v1567_v1  ;;  %v1583_v50 = vadd.f32 1.0, %v3666_v19  ;;  %v1767_v19 = vmul.f32 %v4704_v33, %v4498_v2 }
 0x1f1   : > { %v4720_v34 = vpop.f32.mrf.mxu1  ;;  %2234 = vmatmul.mubr.bf16.gmra.mxu0 %v1937_v0  ;;  %v3670_v63 = vpop.eup %3669  ;;  %3695 = vrcp.f32 %v1570_v61  ;;  %v1584_v37 = vadd.f32 1.0, %v3668_v38  ;;  %v1769_v61 = vmul.f32 %v4718_v54, %v4506_v6  ;;  %v1768_v38 = vmul.f32 %v4709_v42, %v4502_v4 }
 0x1f2   : > { %v3672_v47 = vpop.eup %3671  ;;  %3697 = vrcp.f32 %v1579_v17  ;;  %v1571_v60 = vadd.f32 1.0, %v3670_v63  ;;  %v3076_v63 = vmul.f32 -1.442695, %v4562_v35 }
 0x1f3   : > { %v4725_v53 = vpop.f32.mrf.mxu1  ;;  %v3674_v7 = vpop.eup %3673  ;;  %3699 = vrcp.f32 %v1581_v31  ;;  %v1572_v40 = vadd.f32 1.0, %v3672_v47 }
 0x1f4   : > { %v3676_v46 = vpop.eup %3675  ;;  %3701 = vrcp.f32 %v1580_v43  ;;  %v1585_v56 = vadd.f32 1.0, %v3674_v7 }
 0x1f5   : > { %v4729_v62 = vpop.f32.mrf.mxu1  ;;  %v3678_v13 = vpop.eup %3677  ;;  %3703 = vrcp.f32 %v1582_v45  ;;  %v1573_v24 = vadd.f32 1.0, %v3676_v46  ;;  %v5037_v45 = vld [vmem:[#allocation22_spill] sm:$0xff]  ;;  %v1770_v46 = vmul.f32 %v4722_v21, %v4510_v8 }
 0x1f6   : > { %v3680_v59 = vpop.eup %3679  ;;  %3705 = vrcp.f32 %v1572_v40  ;;  %v1586_v0 = vadd.f32 1.0, %v3678_v13  ;;  %v3078_v47 = vmul.f32 -1.442695, %v5037_v45 }
 0x1f7   : > { %v4732_v49 = vpop.f32.mrf.mxu1  ;;  %v3682_v3 = vpop.eup %3681  ;;  %3707 = vrcp.f32 %v1573_v24  ;;  %v1574_v51 = vadd.f32 1.0, %v3680_v59 }
 0x1f8   : > { %v3684_v57 = vpop.eup %3683  ;;  %3709 = vrcp.f32 %v1571_v60  ;;  %v1587_v11 = vadd.f32 1.0, %v3682_v3 }
 0x1f9   : > { %v4734_v5 = vpop.f32.mrf.mxu1  ;;  %v3686_v1 = vpop.eup %3685  ;;  %3711 = vrcp.f32 %v1574_v51  ;;  %v1588_v3 = vadd.f32 1.0, %v3684_v57 }
 0x1fa   : > { %v3688_v58 = vpop.eup %3687  ;;  %3713 = vrcp.f32 %v1583_v50  ;;  %v1589_v54 = vadd.f32 1.0, %v3686_v1 }
 0x1fb   : > { %v4736_v26 = vpop.f32.mrf.mxu1  ;;  %v3690_v31 = vpop.eup %3689  ;;  %3715 = vrcp.f32 %v1585_v56  ;;  %v1590_v56 = vadd.f32 1.0, %v3688_v58 }
 0x1fc   : > { %v3692_v43 = vpop.eup %3691  ;;  %3717 = vrcp.f32 %v1584_v37  ;;  %v1760_v4 = vmul.f32 %v3690_v31, %v4650_v9 }
 0x1fd   : > { %v1272_v52 = vpop.f32.mrf.mxu1  ;;  %v3694_v40 = vpop.eup %3693  ;;  %3719 = vrcp.f32 %v1586_v0  ;;  %v1761_v42 = vmul.f32 %v3692_v43, %v4658_v28 }
 0x1fe   : > { %v4748_v2 = vmul.f32 %v1767_v19, %v1272_v52  ;;  %v3696_v6 = vpop.eup %3695  ;;  %3721 = vrcp.f32 %v1587_v11  ;;  %v1759_v51 = vmul.f32 %v3694_v40, %v4647_v44  ;;  %v1824_v52 = vmul.f32 %v1760_v4, %v4716_v16  ;;  %v5040_v40 = vld [vmem:[#allocation24_spill] sm:$0xff] }
 0x1ff   : > { %v1274_v17 = vpop.f32.mrf.mxu1  ;;  %v3698_v13 = vpop.eup %3697  ;;  %v1762_v24 = vmul.f32 %v3696_v6, %v4662_v55  ;;  %v1825_v9 = vmul.f32 %v1761_v42, %v4720_v34  ;;  %3723 = vpow2.f32 %v3078_v47 }
 0x200   : > { %v4755_v59 = vmul.f32 %v1768_v38, %v1274_v17  ;;  %v3700_v50 = vpop.eup %3699  ;;  %3725 = vrcp.f32 %v1589_v54  ;;  %v1823_v11 = vmul.f32 %v1759_v51, %v4713_v39  ;;  %v1771_v44 = vmul.f32 %v3698_v13, %v4514_v10 }
 0x201   : > { %v1276_v7 = vpop.f32.mrf.mxu1  ;;  %v3702_v28 = vpop.eup %3701  ;;  %v1826_v55 = vmul.f32 %v1762_v24, %v4725_v53  ;;  %v1773_v34 = vmul.f32 %v3700_v50, %v4522_v15  ;;  %3727 = vpow2.f32 %v3076_v63  ;;  %v5038_v53 = vld [vmem:[#allocation26_spill] sm:$0xff]  ;;  %v5039_v63 = vld [vmem:[#allocation21_spill] sm:$0xff]  ;;  %v5041_v50 = vld [vmem:[#allocation20_spill] sm:$0xff] }
 0x202   : > { %v4750_v33 = vmul.f32 %v1769_v61, %v1276_v7  ;;  %v3704_v0 = vpop.eup %3703  ;;  %v1772_v16 = vmul.f32 %v3702_v28, %v4518_v12  ;;  %3729 = vrcp.f32 %v1588_v3  ;;  %v3082_v19 = vmul.f32 -1.442695, %v5038_v53 }
 0x203   : > { %v1278_v60 = vpop.f32.mrf.mxu1  ;;  %v3706_v58 = vpop.eup %3705  ;;  %v1940_v17 = vpack.c.bf16 %v1826_v55, %v1824_v52  ;;  %v1939_v61 = vpack.c.bf16 %v1825_v9, %v1823_v11  ;;  %v1774_v47 = vmul.f32 %v3704_v0, %v4526_v18  ;;  %3731 = vrcp.f32 %v1590_v56 }
 0x204   : > { %v1943_v8 = vpack.c.bf16 %v4750_v33, %v4748_v2  ;;  %v4759_v21 = vmul.f32 %v1770_v46, %v1278_v60  ;;  %v3708_v31 = vpop.eup %3707  ;;  %v3077_v7 = vmul.f32 -1.442695, %v5039_v63  ;;  %v3080_v46 = vmul.f32 -1.442695, %v5040_v40 }
 0x205   : > { %v1282_v37 = vpop.f32.mrf.mxu1  ;;  %v3710_v38 = vpop.eup %3709  ;;  %2243 = vmatprep.mubr.bf16.mxu0 %v1940_v17  ;;  %v1764_v12 = vmul.f32 %v3706_v58, %v4674_v29  ;;  %v1765_v6 = vmul.f32 %v3708_v31, %v4680_v41  ;;  %v3075_v3 = vmul.f32 -1.442695, %v5041_v50  ;;  %3733 = vpow2.f32 %v3082_v19 }
 0x206   : > { %v1944_v1 = vpack.c.bf16 %v4759_v21, %v4755_v59  ;;  %v4773_v39 = vmul.f32 %v1771_v44, %v1282_v37  ;;  %v3712_v15 = vpop.eup %3711  ;;  %2244 = vmatmul.mubr.bf16.gmra.mxu0 %v1939_v61  ;;  %v1763_v56 = vmul.f32 %v3710_v38, %v4670_v48  ;;  %3735 = vpow2.f32 %v3077_v7  ;;  %v5044_v61 = vld [vmem:[#allocation28_spill] sm:$0xff] }
 0x207   : > { %v1284_v57 = vpop.f32.mrf.mxu1  ;;  %v3714_v4 = vpop.eup %3713  ;;  %v1766_v18 = vmul.f32 %v3712_v15, %v4697_v14  ;;  %v1829_v29 = vmul.f32 %v1765_v6, %v4734_v5  ;;  %v1828_v9 = vmul.f32 %v1764_v12, %v4732_v49  ;;  %3737 = vpow2.f32 %v3080_v46  ;;  %v5045_v15 = vld [vmem:[#allocation23_spill] sm:$0xff] }
 0x208   : > { %v4782_v42 = vmul.f32 %v1772_v16, %v1284_v57  ;;  %v3716_v24 = vpop.eup %3715  ;;  %v1827_v52 = vmul.f32 %v1763_v56, %v4729_v62  ;;  %v1775_v48 = vmul.f32 %v3714_v4, %v4530_v20  ;;  %3739 = vpow2.f32 %v3075_v3  ;;  %v5042_v57 = vld [vmem:[#allocation30_spill] sm:$0xff]  ;;  %v5043_v20 = vld [vmem:[#allocation25_spill] sm:$0xff] }
 0x209   : > { %v1286_v43 = vpop.f32.mrf.mxu1  ;;  %v3718_v51 = vpop.eup %3717  ;;  %v1830_v14 = vmul.f32 %v1766_v18, %v4736_v26  ;;  %v1777_v5 = vmul.f32 %v3716_v24, %v4536_v23  ;;  %v3086_v49 = vmul.f32 -1.442695, %v5042_v57  ;;  %v3081_v16 = vmul.f32 -1.442695, %v5043_v20 }
 0x20a   : > { %v4775_v10 = vmul.f32 %v1773_v34, %v1286_v43  ;;  %v3720_v28 = vpop.eup %3719  ;;  %v1941_v58 = vpack.c.bf16 %v1829_v29, %v1827_v52  ;;  %v1776_v44 = vmul.f32 %v3718_v51, %v4534_v22  ;;  %v3084_v43 = vmul.f32 -1.442695, %v5044_v61 }
 0x20b   : > { %v1288_v54 = vpop.f32.mrf.mxu1  ;;  %v3722_v0 = vpop.eup %3721  ;;  %v1942_v11 = vpack.c.bf16 %v1830_v14, %v1828_v9  ;;  %v1778_v34 = vmul.f32 %v3720_v28, %v4540_v25  ;;  %v3079_v7 = vmul.f32 -1.442695, %v5045_v15  ;;  %3741 = vpow2.f32 %v3086_v49  ;;  %v5047_v9 = vld [vmem:[#allocation29_spill] sm:$0xff]  ;;  %v5048_v14 = vld [vmem:[#allocation32_spill] sm:$0xff] }
 0x20c   : > { %v1945_v60 = vpack.c.bf16 %v4775_v10, %v4773_v39  ;;  %v4786_v13 = vmul.f32 %v1774_v47, %v1288_v54  ;;  %v3724_v31 = vpop.eup %3723  ;;  %3743 = vpow2.f32 %v3081_v16 }
 0x20d   : > { %v1292_v41 = vpop.f32.mrf.mxu1  ;;  %2253 = vmatprep.mubr.bf16.mxu0 %v1942_v11  ;;  %v3726_v19 = vpop.eup %3725  ;;  %v1594_v6 = vadd.f32 1.0, %v3724_v31  ;;  %3745 = vpow2.f32 %v3084_v43  ;;  %v5050_v31 = vld [vmem:[#allocation33_spill] sm:$0xff] }
 0x20e   : > { %v1946_v37 = vpack.c.bf16 %v4786_v13, %v4782_v42  ;;  %v4801_v17 = vmul.f32 %v1775_v48, %v1292_v41  ;;  %2254 = vmatmul.mubr.bf16.gmra.mxu0 %v1941_v58  ;;  %v3728_v47 = vpop.eup %3727  ;;  %v1779_v42 = vmul.f32 %v3722_v0, %v4543_v27  ;;  %v1781_v59 = vmul.f32 %v3726_v19, %v4551_v32  ;;  %v5046_v13 = vld [vmem:[#allocation34_spill] sm:$0xff]  ;;  %v5049_v48 = vld [vmem:[#allocation27_spill] sm:$0xff] }
 0x20f   : > { %v1294_v55 = vpop.f32.mrf.mxu1  ;;  %2263 = vmatprep.mubr.bf16.mxu0 %v1944_v1  ;;  %v3730_v12 = vpop.eup %3729  ;;  %v1592_v21 = vadd.f32 1.0, %v3728_v47  ;;  %3747 = vpow2.f32 %v3079_v7  ;;  %v3090_v24 = vmul.f32 -1.442695, %v5046_v13  ;;  %v3085_v27 = vmul.f32 -1.442695, %v5047_v9 }
 0x210   : > { %v1840_v22 = vmul.f32 %v1776_v44, %v1294_v55  ;;  %v3732_v4 = vpop.eup %3731  ;;  %v1780_v1 = vmul.f32 %v3730_v12, %v4548_v30  ;;  %3749 = vrcp.f32 %v1594_v6  ;;  %v3088_v32 = vmul.f32 -1.442695, %v5048_v14 }
 0x211   : > { %v1296_v26 = vpop.f32.mrf.mxu1  ;;  %v1782_v56 = vmul.f32 %v3732_v4, %v4556_v36  ;;  %3751 = vrcp.f32 %v1592_v21  ;;  %v3089_v16 = vmul.f32 -1.442695, %v5050_v31 }
 0x212   : > { %v4803_v62 = vmul.f32 %v1777_v5, %v1296_v26  ;;  %v3734_v51 = vpop.eup %3733  ;;  %v3083_v5 = vmul.f32 -1.442695, %v5049_v48  ;;  %3753 = vpow2.f32 %v3090_v24 }
 0x213   : > { %v1298_v23 = vpop.f32.mrf.mxu1  ;;  %v3736_v28 = vpop.eup %3735  ;;  %v1598_v58 = vadd.f32 1.0, %v3734_v51  ;;  %3755 = vpow2.f32 %v3085_v27 }
 0x214   : > { %v1947_v25 = vpack.c.bf16 %v4803_v62, %v4801_v17  ;;  %v1842_v38 = vmul.f32 %v1778_v34, %v1298_v23  ;;  %v3738_v0 = vpop.eup %3737  ;;  %v1593_v2 = vadd.f32 1.0, %v3736_v28  ;;  %3757 = vpow2.f32 %v3088_v32 }
 0x215   : > { %v1302_v46 = vpop.f32.mrf.mxu1  ;;  %v3740_v49 = vpop.eup %3739  ;;  %3759 = vpow2.f32 %v3083_v5 }
 0x216   : > { %v1948_v54 = vpack.c.bf16 %v1842_v38, %v1840_v22  ;;  %v4818_v29 = vmul.f32 %v1779_v42, %v1302_v46  ;;  %2264 = vmatmul.mubr.bf16.gmra.mxu0 %v1943_v8  ;;  %v1596_v8 = vadd.f32 1.0, %v3738_v0  ;;  %3761 = vrcp.f32 %v1598_v58  ;;  %v5051_v22 = vld [vmem:[#allocation31_spill] sm:$0xff] }
 0x217   : > { %v1304_v18 = vpop.f32.mrf.mxu1  ;;  %2273 = vmatprep.mubr.bf16.mxu0 %v1946_v37  ;;  %v1591_v37 = vadd.f32 1.0, %v3740_v49  ;;  %3763 = vrcp.f32 %v1593_v2  ;;  %v3087_v38 = vmul.f32 -1.442695, %v5051_v22 }
 0x218   : > { %v1844_v52 = vmul.f32 %v1780_v1, %v1304_v18  ;;  %v3742_v34 = vpop.eup %3741  ;;  %3765 = vrcp.f32 %v1596_v8 }
 0x219   : > { %v1306_v3 = vpop.f32.mrf.mxu1  ;;  %v3744_v19 = vpop.eup %3743  ;;  %3767 = vrcp.f32 %v1591_v37  ;;  %v1602_v46 = vadd.f32 1.0, %v3742_v34 }
 0x21a   : > { %v4820_v41 = vmul.f32 %v1781_v59, %v1306_v3  ;;  %v3746_v43 = vpop.eup %3745  ;;  %v1597_v6 = vadd.f32 1.0, %v3744_v19  ;;  %3769 = vpow2.f32 %v3089_v16 }
 0x21b   : > { %v1308_v30 = vpop.f32.mrf.mxu1  ;;  %v1600_v18 = vadd.f32 1.0, %v3746_v43  ;;  %3771 = vpow2.f32 %v3087_v38 }
 0x21c   : > { %v1949_v36 = vpack.c.bf16 %v4820_v41, %v4818_v29  ;;  %v1846_v55 = vmul.f32 %v1782_v56, %v1308_v30  ;;  %v3748_v7 = vpop.eup %3747  ;;  %3773 = vrcp.f32 %v1602_v46 }
 0x21d   : > { %v4830_v11 = vpop.f32.mrf.mxu1  ;;  %v3750_v12 = vpop.eup %3749  ;;  %v1595_v39 = vadd.f32 1.0, %v3748_v7  ;;  %3775 = vrcp.f32 %v1597_v6 }
 0x21e   : > { %v1950_v26 = vpack.c.bf16 %v1846_v55, %v1844_v52  ;;  %2274 = vmatmul.mubr.bf16.gmra.mxu0 %v1945_v60  ;;  %v3752_v42 = vpop.eup %3751  ;;  %v1786_v60 = vmul.f32 %v3750_v12, %v5037_v45  ;;  %3777 = vrcp.f32 %v1600_v18 }
 0x21f   : > { %v1314_v33 = vpop.f32.mrf.mxu1  ;;  %2283 = vmatprep.mubr.bf16.mxu0 %v1948_v54  ;;  %v3754_v54 = vpop.eup %3753  ;;  %v1784_v1 = vmul.f32 %v3752_v42, %v4562_v35  ;;  %3779 = vrcp.f32 %v1595_v39 }
 0x220   : > { %v3756_v21 = vpop.eup %3755  ;;  %v1606_v45 = vadd.f32 1.0, %v3754_v54 }
 0x221   : > { %v4832_v44 = vpop.f32.mrf.mxu1  ;;  %v3758_v3 = vpop.eup %3757  ;;  %v1848_v27 = vmul.f32 %v1784_v1, %v1314_v33  ;;  %v1601_v30 = vadd.f32 1.0, %v3756_v21 }
 0x222   : > { %v3760_v51 = vpop.eup %3759  ;;  %v1604_v17 = vadd.f32 1.0, %v3758_v3  ;;  %3781 = vrcp.f32 %v1606_v45 }
 0x223   : > { %v1318_v23 = vpop.f32.mrf.mxu1  ;;  %v3762_v32 = vpop.eup %3761  ;;  %v1599_v55 = vadd.f32 1.0, %v3760_v51  ;;  %3783 = vrcp.f32 %v1601_v30 }
 0x224   : > { %v1850_v24 = vmul.f32 %v1786_v60, %v1318_v23  ;;  %v3764_v52 = vpop.eup %3763  ;;  %v1790_v5 = vmul.f32 %v3762_v32, %v5038_v53  ;;  %3785 = vrcp.f32 %v1604_v17  ;;  %v1863_v17 = vld [vmem:[#allocation2 + $0xb0] sm:$0xff] }
 0x225   : > { %v4839_v47 = vpop.f32.mrf.mxu1  ;;  %v1785_v49 = vmul.f32 %v3764_v52, %v5039_v63  ;;  %3787 = vrcp.f32 %v1599_v55 }
 0x226   : > { %2284 = vmatmul.mubr.bf16.gmra.mxu0 %v1947_v25  ;;  %v1952_v62 = vpack.c.bf16 %v1850_v24, %v1848_v27  ;;  %v3766_v25 = vpop.eup %3765 }
 0x227   : > { %v1324_v4 = vpop.f32.mrf.mxu1  ;;  %2293 = vmatprep.mubr.bf16.mxu0 %v1950_v26  ;;  %v3768_v35 = vpop.eup %3767  ;;  %v1788_v2 = vmul.f32 %v3766_v25, %v5040_v40  ;;  %v1849_v53 = vmul.f32 %v1785_v49, %v4832_v44 }
 0x228   : > { %v3770_v26 = vpop.eup %3769  ;;  %v1783_v8 = vmul.f32 %v3768_v35, %v5041_v50 }
 0x229   : > { %v4841_v10 = vpop.f32.mrf.mxu1  ;;  %v3772_v34 = vpop.eup %3771  ;;  %v1852_v63 = vmul.f32 %v1788_v2, %v1324_v4  ;;  %v1605_v23 = vadd.f32 1.0, %v3770_v26  ;;  %v1868_v2 = vld [vmem:[#allocation2 + $0x168] sm:$0xff] }
 0x22a   : > { %v3774_v16 = vpop.eup %3773  ;;  %v1847_v29 = vmul.f32 %v1783_v8, %v4830_v11  ;;  %v1603_v43 = vadd.f32 1.0, %v3772_v34 }
 0x22b   : > { %v1328_v59 = vpop.f32.mrf.mxu1  ;;  %v3776_v41 = vpop.eup %3775  ;;  %v1794_v46 = vmul.f32 %v3774_v16, %v5042_v57  ;;  %3789 = vrcp.f32 %v1605_v23 }
 0x22c   : > { %v1854_v33 = vmul.f32 %v1790_v5, %v1328_v59  ;;  %v3778_v19 = vpop.eup %3777  ;;  %v1951_v40 = vpack.c.bf16 %v1849_v53, %v1847_v29  ;;  %v1789_v50 = vmul.f32 %v3776_v41, %v5043_v20  ;;  %3791 = vrcp.f32 %v1603_v43  ;;  %v1866_v5 = vld [vmem:[#allocation2 + $0x18] sm:$0xff]  ;;  %v1869_v53 = vld [vmem:[#allocation2 + $0x130] sm:$0xff]  ;;  %v1871_v29 = vld [vmem:[#allocation2 + $0x180] sm:$0xff] }
 0x22d   : > { %v4848_v56 = vpop.f32.mrf.mxu1  ;;  %v3780_v7 = vpop.eup %3779  ;;  %v1792_v44 = vmul.f32 %v3778_v19, %v5044_v61  ;;  %v1872_v19 = vld [vmem:[#allocation2 + $0x110] sm:$0xff] }
 0x22e   : > { %2294 = vmatmul.mubr.bf16.gmra.mxu0 %v1949_v36  ;;  %v1954_v36 = vpack.c.bf16 %v1854_v33, %v1852_v63  ;;  %v1787_v6 = vmul.f32 %v3780_v7, %v5045_v15  ;;  %v1853_v11 = vmul.f32 %v1789_v50, %v4841_v10  ;;  %v1870_v63 = vld [vmem:[#allocation2 + $0x48] sm:$0xff]  ;;  %v1874_v50 = vld [vmem:[#allocation2 + $0x98] sm:$0xff] }
 0x22f   : > { %v1334_v28 = vpop.f32.mrf.mxu1  ;;  %2303 = vmatprep.mubr.bf16.mxu0 %v1952_v62  ;;  %v3782_v42 = vpop.eup %3781  ;;  %v1864_v62 = vld [vmem:[#allocation2 + $0x1b0] sm:$0xff] }
 0x230   : > { %v1856_v18 = vmul.f32 %v1792_v44, %v1334_v28  ;;  %v1851_v39 = vmul.f32 %v1787_v6, %v4839_v47  ;;  %v3784_v60 = vpop.eup %3783  ;;  %v1798_v61 = vmul.f32 %v3782_v42, %v5046_v13  ;;  %v1875_v6 = vld [vmem:[#allocation2 + $0x120] sm:$0xff] }
 0x231   : > { %v1336_v0 = vpop.f32.mrf.mxu1  ;;  %v3786_v54 = vpop.eup %3785  ;;  %v1793_v1 = vmul.f32 %v3784_v60, %v5047_v9  ;;  %v1877_v60 = vld [vmem:[#allocation2 + $0x108] sm:$0xff] }
 0x232   : > { %v1953_v20 = vpack.c.bf16 %v1853_v11, %v1851_v39  ;;  %v3788_v21 = vpop.eup %3787  ;;  %v1796_v15 = vmul.f32 %v3786_v54, %v5048_v14 }
 0x233   : > { %v1338_v58 = vpop.f32.mrf.mxu1  ;;  %v1791_v24 = vmul.f32 %v3788_v21, %v5049_v48  ;;  %v1857_v3 = vmul.f32 %v1793_v1, %v1336_v0  ;;  %v1879_v1 = vld [vmem:[#allocation2 + $0xe0] sm:$0xff] }
 0x234   : > { %v1858_v12 = vmul.f32 %v1794_v46, %v1338_v58  ;;  %v1867_v58 = vld [vmem:[#allocation2 + $0x50] sm:$0xff] }
 0x235   : > { %v1342_v37 = vpop.f32.mrf.mxu1  ;;  %v1855_v47 = vmul.f32 %v1791_v24, %v4848_v56  ;;  %v1865_v56 = vld [vmem:[#allocation2 + $0xd8] sm:$0xff] }
 0x236   : > { %2304 = vmatmul.mubr.bf16.gmra.mxu0 %v1951_v40  ;;  %v1956_v57 = vpack.c.bf16 %v1858_v12, %v1856_v18  ;;  %v1876_v18 = vld [vmem:[#allocation2 + $0x150] sm:$0xff] }
 0x237   : > { %v1344_v38 = vpop.f32.mrf.mxu1  ;;  %2313 = vmatprep.mubr.bf16.mxu0 %v1954_v36  ;;  %v1955_v32 = vpack.c.bf16 %v1857_v3, %v1855_v47 }
 0x238   : > { %v1860_v51 = vmul.f32 %v1796_v15, %v1344_v38  ;;  %v3790_v45 = vpop.eup %3789  ;;  %v1873_v38 = vld [vmem:[#allocation2 + $0x118] sm:$0xff] }
 0x239   : > { %v1346_v4 = vpop.f32.mrf.mxu1  ;;  %v3792_v30 = vpop.eup %3791  ;;  %v1797_v28 = vmul.f32 %v3790_v45, %v5050_v31 }
 0x23a   : > { %v1795_v13 = vmul.f32 %v3792_v30, %v5051_v22 }
 0x23b   : > { %v1348_v59 = vpop.f32.mrf.mxu1  ;;  %v1861_v9 = vmul.f32 %v1797_v28, %v1346_v4  ;;  %v1883_v28 = vld [vmem:[#allocation2 + $0x80] sm:$0xff] }
 0x23c   : > { %v1862_v10 = vmul.f32 %v1798_v61, %v1348_v59  ;;  %v1859_v14 = vmul.f32 %v1795_v13, %v1342_v37 }
 0x23e   : > { %2314 = vmatmul.mubr.bf16.gmra.mxu0 %v1953_v20  ;;  %v1958_v27 = vpack.c.bf16 %v1862_v10, %v1860_v51  ;;  %v1957_v52 = vpack.c.bf16 %v1861_v9, %v1859_v14  ;;  %v1878_v20 = vld [vmem:[#allocation2 + $0x60] sm:$0xff]  ;;  %v1880_v10 = vld [vmem:[#allocation2 + $0x188] sm:$0xff]  ;;  %v1881_v51 = vld [vmem:[#allocation2 + $0x138] sm:$0xff] }
 0x23f   : > { %2323 = vmatprep.mubr.bf16.mxu0 %v1956_v57  ;;  %v1884_v14 = vld [vmem:[#allocation2 + $0x1a8] sm:$0xff] }
 0x246   : > { %2324 = vmatmul.mubr.bf16.gmra.mxu0 %v1955_v32 }
 0x247   : > { %2333 = vmatprep.mubr.bf16.mxu0 %v1958_v27  ;;  %v1882_v27 = vld [vmem:[#allocation2 + $0x140] sm:$0xff] }
 0x24e   : > { %2334 = vmatmul.mubr.bf16.gmra.mxu0 %v1957_v52 }
 0x289   : > { %v2185_v48 = vpop.f32.mrf.mxu0 }
 0x28a   : > { %v2344_v25 = vadd.f32 %v2185_v48, %v1863_v17  ;;  %v1885_v48 = vld [vmem:[#allocation2 + $0x1b8] sm:$0xff] }
 0x28b   : > { %v2187_v55 = vpop.f32.mrf.mxu0 }
 0x28c   : > { %2408 = vst [vmem:[#allocation2 + $0xb0] sm:$0xff] %v2344_v25  ;;  %v2345_v0 = vadd.f32 %v2187_v55, %v1864_v62  ;;  %v1886_v55 = vld [vmem:[#allocation2 + $0x28] sm:$0xff] }
 0x28d   : > { %v2189_v35 = vpop.f32.mrf.mxu0 }
 0x28e   : > { %2409 = vst [vmem:[#allocation2 + $0x1b0] sm:$0xff] %v2345_v0  ;;  %v2346_v31 = vadd.f32 %v2189_v35, %v1865_v56 }
 0x28f   : > { %v2191_v49 = vpop.f32.mrf.mxu0 }
 0x290   : > { %2410 = vst [vmem:[#allocation2 + $0xd8] sm:$0xff] %v2346_v31  ;;  %v2347_v22 = vadd.f32 %v2191_v49, %v1866_v5  ;;  %v1887_v5 = vld [vmem:[#allocation2 + $0x1e8] sm:$0xff]  ;;  %v1888_v49 = vld [vmem:[#allocation2 + $0xf8] sm:$0xff] }
 0x291   : > { %v2195_v26 = vpop.f32.mrf.mxu0 }
 0x292   : > { %2411 = vst [vmem:[#allocation2 + $0x18] sm:$0xff] %v2347_v22  ;;  %v2348_v33 = vadd.f32 %v2195_v26, %v1867_v58  ;;  %v1889_v26 = vld [vmem:[#allocation2 + $0x160] sm:$0xff] }
 0x293   : > { %v2197_v8 = vpop.f32.mrf.mxu0 }
 0x294   : > { %2412 = vst [vmem:[#allocation2 + $0x50] sm:$0xff] %v2348_v33  ;;  %v2349_v37 = vadd.f32 %v2197_v8, %v1868_v2  ;;  %v1890_v8 = vld [vmem:[#allocation2 + $0x30] sm:$0xff] }
 0x295   : > { %v2199_v34 = vpop.f32.mrf.mxu0 }
 0x296   : > { %2413 = vst [vmem:[#allocation2 + $0x168] sm:$0xff] %v2349_v37  ;;  %v2350_v16 = vadd.f32 %v2199_v34, %v1869_v53  ;;  %v1891_v34 = vld [vmem:[#allocation2 + $0x1e0] sm:$0xff] }
 0x297   : > { %v2201_v23 = vpop.f32.mrf.mxu0 }
 0x298   : > { %2414 = vst [vmem:[#allocation2 + $0x130] sm:$0xff] %v2350_v16  ;;  %v2351_v41 = vadd.f32 %v2201_v23, %v1870_v63  ;;  %v1892_v23 = vld [vmem:[#allocation2] sm:$0xff] }
 0x299   : > { %v2205_v36 = vpop.f32.mrf.mxu0 }
 0x29a   : > { %2415 = vst [vmem:[#allocation2 + $0x48] sm:$0xff] %v2351_v41  ;;  %v2352_v43 = vadd.f32 %v2205_v36, %v1871_v29  ;;  %v1893_v36 = vld [vmem:[#allocation2 + $0xf0] sm:$0xff] }
 0x29b   : > { %v2207_v40 = vpop.f32.mrf.mxu0 }
 0x29c   : > { %2416 = vst [vmem:[#allocation2 + $0x180] sm:$0xff] %v2352_v43  ;;  %v2353_v7 = vadd.f32 %v2207_v40, %v1872_v19  ;;  %v1894_v40 = vld [vmem:[#allocation2 + $0x8] sm:$0xff] }
 0x29d   : > { %v2209_v46 = vpop.f32.mrf.mxu0 }
 0x29e   : > { %2417 = vst [vmem:[#allocation2 + $0x110] sm:$0xff] %v2353_v7  ;;  %v2354_v44 = vadd.f32 %v2209_v46, %v1873_v38  ;;  %v1895_v46 = vld [vmem:[#allocation2 + $0x148] sm:$0xff] }
 0x29f   : > { %v2211_v12 = vpop.f32.mrf.mxu0 }
 0x2a0   : > { %2418 = vst [vmem:[#allocation2 + $0x118] sm:$0xff] %v2354_v44  ;;  %v2355_v11 = vadd.f32 %v2211_v12, %v1874_v50  ;;  %v1896_v12 = vld [vmem:[#allocation2 + $0x1d0] sm:$0xff] }
 0x2a1   : > { %v2215_v4 = vpop.f32.mrf.mxu0 }
 0x2a2   : > { %2419 = vst [vmem:[#allocation2 + $0x98] sm:$0xff] %v2355_v11  ;;  %v2356_v42 = vadd.f32 %v2215_v4, %v1875_v6  ;;  %v1897_v4 = vld [vmem:[#allocation2 + $0x100] sm:$0xff] }
 0x2a3   : > { %v2217_v39 = vpop.f32.mrf.mxu0 }
 0x2a4   : > { %2420 = vst [vmem:[#allocation2 + $0x120] sm:$0xff] %v2356_v42  ;;  %v2357_v57 = vadd.f32 %v2217_v39, %v1876_v18  ;;  %v1898_v39 = vld [vmem:[#allocation2 + $0xc8] sm:$0xff] }
 0x2a5   : > { %v2219_v54 = vpop.f32.mrf.mxu0 }
 0x2a6   : > { %2421 = vst [vmem:[#allocation2 + $0x150] sm:$0xff] %v2357_v57  ;;  %v2358_v59 = vadd.f32 %v2219_v54, %v1877_v60  ;;  %v1899_v54 = vld [vmem:[#allocation2 + $0x40] sm:$0xff] }
 0x2a7   : > { %v2221_v21 = vpop.f32.mrf.mxu0 }
 0x2a8   : > { %2422 = vst [vmem:[#allocation2 + $0x108] sm:$0xff] %v2358_v59  ;;  %v2359_v61 = vadd.f32 %v2221_v21, %v1878_v20  ;;  %v1900_v21 = vld [vmem:[#allocation2 + $0x1f8] sm:$0xff] }
 0x2a9   : > { %v2225_v15 = vpop.f32.mrf.mxu0 }
 0x2aa   : > { %2423 = vst [vmem:[#allocation2 + $0x60] sm:$0xff] %v2359_v61  ;;  %v2360_v24 = vadd.f32 %v2225_v15, %v1879_v1  ;;  %v1901_v15 = vld [vmem:[#allocation2 + $0x20] sm:$0xff] }
 0x2ab   : > { %v2227_v3 = vpop.f32.mrf.mxu0 }
 0x2ac   : > { %2424 = vst [vmem:[#allocation2 + $0xe0] sm:$0xff] %v2360_v24  ;;  %v2361_v47 = vadd.f32 %v2227_v3, %v1880_v10  ;;  %v1902_v3 = vld [vmem:[#allocation2 + $0x128] sm:$0xff] }
 0x2ad   : > { %v2229_v45 = vpop.f32.mrf.mxu0 }
 0x2ae   : > { %2425 = vst [vmem:[#allocation2 + $0x188] sm:$0xff] %v2361_v47  ;;  %v2362_v32 = vadd.f32 %v2229_v45, %v1881_v51  ;;  %v1903_v45 = vld [vmem:[#allocation2 + $0x1a0] sm:$0xff] }
 0x2af   : > { %v2231_v30 = vpop.f32.mrf.mxu0 }
 0x2b0   : > { %2426 = vst [vmem:[#allocation2 + $0x138] sm:$0xff] %v2362_v32  ;;  %v2363_v13 = vadd.f32 %v2231_v30, %v1882_v27  ;;  %v1904_v30 = vld [vmem:[#allocation2 + $0x1f0] sm:$0xff] }
 0x2b1   : > { %v2235_v9 = vpop.f32.mrf.mxu0 }
 0x2b2   : > { %2427 = vst [vmem:[#allocation2 + $0x140] sm:$0xff] %v2363_v13  ;;  %v2364_v52 = vadd.f32 %v2235_v9, %v1883_v28  ;;  %v1905_v9 = vld [vmem:[#allocation2 + $0xe8] sm:$0xff] }
 0x2b3   : > { %v2237_v17 = vpop.f32.mrf.mxu0 }
 0x2b4   : > { %2428 = vst [vmem:[#allocation2 + $0x80] sm:$0xff] %v2364_v52  ;;  %v2365_v62 = vadd.f32 %v2237_v17, %v1884_v14  ;;  %v1906_v17 = vld [vmem:[#allocation2 + $0x78] sm:$0xff] }
 0x2b5   : > { %v2239_v25 = vpop.f32.mrf.mxu0 }
 0x2b6   : > { %2429 = vst [vmem:[#allocation2 + $0x1a8] sm:$0xff] %v2365_v62  ;;  %v2366_v56 = vadd.f32 %v2239_v25, %v1885_v48  ;;  %v1907_v25 = vld [vmem:[#allocation2 + $0x70] sm:$0xff] }
 0x2b7   : > { %v2241_v0 = vpop.f32.mrf.mxu0 }
 0x2b8   : > { %2430 = vst [vmem:[#allocation2 + $0x1b8] sm:$0xff] %v2366_v56  ;;  %v2367_v35 = vadd.f32 %v2241_v0, %v1886_v55  ;;  %v1908_v0 = vld [vmem:[#allocation2 + $0x90] sm:$0xff] }
 0x2ba   : > { %2431 = vst [vmem:[#allocation2 + $0x28] sm:$0xff] %v2367_v35 }
 0x2c6   : > { %v2245_v31 = vpop.f32.mrf.mxu0 }
 0x2c7   : > { %v2368_v58 = vadd.f32 %v2245_v31, %v1887_v5  ;;  %v1909_v31 = vld [vmem:[#allocation2 + $0x1d8] sm:$0xff] }
 0x2c8   : > { %v2247_v22 = vpop.f32.mrf.mxu0 }
 0x2c9   : > { %2432 = vst [vmem:[#allocation2 + $0x1e8] sm:$0xff] %v2368_v58  ;;  %v2369_v2 = vadd.f32 %v2247_v22, %v1888_v49  ;;  %v1910_v22 = vld [vmem:[#allocation2 + $0xd0] sm:$0xff] }
 0x2ca   : > { %v2249_v33 = vpop.f32.mrf.mxu0 }
 0x2cb   : > { %2433 = vst [vmem:[#allocation2 + $0xf8] sm:$0xff] %v2369_v2  ;;  %v2370_v53 = vadd.f32 %v2249_v33, %v1889_v26  ;;  %v1911_v33 = vld [vmem:[#allocation2 + $0xb8] sm:$0xff] }
 0x2cc   : > { %v2251_v37 = vpop.f32.mrf.mxu0 }
 0x2cd   : > { %2434 = vst [vmem:[#allocation2 + $0x160] sm:$0xff] %v2370_v53  ;;  %v2371_v63 = vadd.f32 %v2251_v37, %v1890_v8  ;;  %v1912_v37 = vld [vmem:[#allocation2 + $0x88] sm:$0xff] }
 0x2ce   : > { %v2255_v16 = vpop.f32.mrf.mxu0 }
 0x2cf   : > { %2435 = vst [vmem:[#allocation2 + $0x30] sm:$0xff] %v2371_v63  ;;  %v2372_v29 = vadd.f32 %v2255_v16, %v1891_v34  ;;  %v1913_v16 = vld [vmem:[#allocation2 + $0xa8] sm:$0xff] }
 0x2d0   : > { %v2257_v41 = vpop.f32.mrf.mxu0 }
 0x2d1   : > { %2436 = vst [vmem:[#allocation2 + $0x1e0] sm:$0xff] %v2372_v29  ;;  %v2373_v19 = vadd.f32 %v2257_v41, %v1892_v23  ;;  %v1914_v41 = vld [vmem:[#allocation2 + $0x1c8] sm:$0xff] }
 0x2d2   : > { %v2259_v43 = vpop.f32.mrf.mxu0 }
 0x2d3   : > { %2437 = vst [vmem:[#allocation2] sm:$0xff] %v2373_v19  ;;  %v2374_v38 = vadd.f32 %v2259_v43, %v1893_v36  ;;  %v1915_v43 = vld [vmem:[#allocation2 + $0x170] sm:$0xff] }
 0x2d4   : > { %v2261_v7 = vpop.f32.mrf.mxu0 }
 0x2d5   : > { %2438 = vst [vmem:[#allocation2 + $0xf0] sm:$0xff] %v2374_v38  ;;  %v2375_v50 = vadd.f32 %v2261_v7, %v1894_v40  ;;  %v1916_v7 = vld [vmem:[#allocation2 + $0x178] sm:$0xff] }
 0x2d6   : > { %v2265_v44 = vpop.f32.mrf.mxu0 }
 0x2d7   : > { %2439 = vst [vmem:[#allocation2 + $0x8] sm:$0xff] %v2375_v50  ;;  %v2376_v6 = vadd.f32 %v2265_v44, %v1895_v46  ;;  %v1917_v44 = vld [vmem:[#allocation2 + $0x68] sm:$0xff] }
 0x2d8   : > { %v2267_v11 = vpop.f32.mrf.mxu0 }
 0x2d9   : > { %2440 = vst [vmem:[#allocation2 + $0x148] sm:$0xff] %v2376_v6  ;;  %v2377_v18 = vadd.f32 %v2267_v11, %v1896_v12  ;;  %v1918_v11 = vld [vmem:[#allocation2 + $0x190] sm:$0xff] }
 0x2da   : > { %v2269_v42 = vpop.f32.mrf.mxu0 }
 0x2db   : > { %2441 = vst [vmem:[#allocation2 + $0x1d0] sm:$0xff] %v2377_v18  ;;  %v2378_v60 = vadd.f32 %v2269_v42, %v1897_v4  ;;  %v1919_v42 = vld [vmem:[#allocation2 + $0x198] sm:$0xff] }
 0x2dc   : > { %v2271_v57 = vpop.f32.mrf.mxu0 }
 0x2dd   : > { %2442 = vst [vmem:[#allocation2 + $0x100] sm:$0xff] %v2378_v60  ;;  %v2379_v20 = vadd.f32 %v2271_v57, %v1898_v39  ;;  %v1920_v57 = vld [vmem:[#allocation2 + $0x38] sm:$0xff] }
 0x2de   : > { %v2275_v59 = vpop.f32.mrf.mxu0 }
 0x2df   : > { %2443 = vst [vmem:[#allocation2 + $0xc8] sm:$0xff] %v2379_v20  ;;  %v2380_v61 = vadd.f32 %v2275_v59, %v1899_v54  ;;  %v1921_v59 = vld [vmem:[#allocation2 + $0xc0] sm:$0xff] }
 0x2e0   : > { %v2277_v1 = vpop.f32.mrf.mxu0 }
 0x2e1   : > { %2444 = vst [vmem:[#allocation2 + $0x40] sm:$0xff] %v2380_v61  ;;  %v2381_v10 = vadd.f32 %v2277_v1, %v1900_v21  ;;  %v1922_v1 = vld [vmem:[#allocation2 + $0x1c0] sm:$0xff] }
 0x2e2   : > { %v2279_v24 = vpop.f32.mrf.mxu0 }
 0x2e3   : > { %2445 = vst [vmem:[#allocation2 + $0x1f8] sm:$0xff] %v2381_v10  ;;  %v2382_v51 = vadd.f32 %v2279_v24, %v1901_v15  ;;  %v1923_v24 = vld [vmem:[#allocation2 + $0x158] sm:$0xff] }
 0x2e4   : > { %v2281_v47 = vpop.f32.mrf.mxu0 }
 0x2e5   : > { %2446 = vst [vmem:[#allocation2 + $0x20] sm:$0xff] %v2382_v51  ;;  %v2383_v27 = vadd.f32 %v2281_v47, %v1902_v3  ;;  %v1924_v47 = vld [vmem:[#allocation2 + $0x10] sm:$0xff] }
 0x2e6   : > { %v2285_v32 = vpop.f32.mrf.mxu0 }
 0x2e7   : > { %2447 = vst [vmem:[#allocation2 + $0x128] sm:$0xff] %v2383_v27  ;;  %v2384_v28 = vadd.f32 %v2285_v32, %v1903_v45  ;;  %v1925_v32 = vld [vmem:[#allocation2 + $0x58] sm:$0xff] }
 0x2e8   : > { %v2287_v13 = vpop.f32.mrf.mxu0 }
 0x2e9   : > { %2448 = vst [vmem:[#allocation2 + $0x1a0] sm:$0xff] %v2384_v28  ;;  %v2385_v14 = vadd.f32 %v2287_v13, %v1904_v30  ;;  %v1926_v13 = vld [vmem:[#allocation2 + $0xa0] sm:$0xff] }
 0x2ea   : > { %v2289_v52 = vpop.f32.mrf.mxu0 }
 0x2eb   : > { %2449 = vst [vmem:[#allocation2 + $0x1f0] sm:$0xff] %v2385_v14  ;;  %v2386_v48 = vadd.f32 %v2289_v52, %v1905_v9 }
 0x2ec   : > { %v2291_v62 = vpop.f32.mrf.mxu0 }
 0x2ed   : > { %2450 = vst [vmem:[#allocation2 + $0xe8] sm:$0xff] %v2386_v48  ;;  %v2387_v55 = vadd.f32 %v2291_v62, %v1906_v17 }
 0x2ee   : > { %v2295_v56 = vpop.f32.mrf.mxu0 }
 0x2ef   : > { %2451 = vst [vmem:[#allocation2 + $0x78] sm:$0xff] %v2387_v55  ;;  %v2388_v35 = vadd.f32 %v2295_v56, %v1907_v25 }
 0x2f0   : > { %v2297_v5 = vpop.f32.mrf.mxu0 }
 0x2f1   : > { %2452 = vst [vmem:[#allocation2 + $0x70] sm:$0xff] %v2388_v35  ;;  %v2389_v49 = vadd.f32 %v2297_v5, %v1908_v0 }
 0x2f2   : > { %v2299_v58 = vpop.f32.mrf.mxu0 }
 0x2f3   : > { %2453 = vst [vmem:[#allocation2 + $0x90] sm:$0xff] %v2389_v49  ;;  %v2390_v26 = vadd.f32 %v2299_v58, %v1909_v31 }
 0x2f4   : > { %v2301_v2 = vpop.f32.mrf.mxu0 }
 0x2f5   : > { %2454 = vst [vmem:[#allocation2 + $0x1d8] sm:$0xff] %v2390_v26  ;;  %v2391_v8 = vadd.f32 %v2301_v2, %v1910_v22 }
 0x2f6   : > { %v2305_v53 = vpop.f32.mrf.mxu0 }
 0x2f7   : > { %2455 = vst [vmem:[#allocation2 + $0xd0] sm:$0xff] %v2391_v8  ;;  %v2392_v34 = vadd.f32 %v2305_v53, %v1911_v33 }
 0x2f8   : > { %v2307_v63 = vpop.f32.mrf.mxu0 }
 0x2f9   : > { %2456 = vst [vmem:[#allocation2 + $0xb8] sm:$0xff] %v2392_v34  ;;  %v2393_v23 = vadd.f32 %v2307_v63, %v1912_v37 }
 0x2fa   : > { %v2309_v29 = vpop.f32.mrf.mxu0 }
 0x2fb   : > { %2457 = vst [vmem:[#allocation2 + $0x88] sm:$0xff] %v2393_v23  ;;  %v2394_v36 = vadd.f32 %v2309_v29, %v1913_v16 }
 0x2fc   : > { %v2311_v19 = vpop.f32.mrf.mxu0 }
 0x2fd   : > { %2458 = vst [vmem:[#allocation2 + $0xa8] sm:$0xff] %v2394_v36  ;;  %v2395_v40 = vadd.f32 %v2311_v19, %v1914_v41 }
 0x2fe   : > { %v2315_v38 = vpop.f32.mrf.mxu0 }
 0x2ff   : > { %2459 = vst [vmem:[#allocation2 + $0x1c8] sm:$0xff] %v2395_v40  ;;  %v2396_v46 = vadd.f32 %v2315_v38, %v1915_v43 }
 0x300   : > { %v2317_v50 = vpop.f32.mrf.mxu0 }
 0x301   : > { %2460 = vst [vmem:[#allocation2 + $0x170] sm:$0xff] %v2396_v46  ;;  %v2397_v12 = vadd.f32 %v2317_v50, %v1916_v7 }
 0x302   : > { %v2319_v6 = vpop.f32.mrf.mxu0 }
 0x303   : > { %2461 = vst [vmem:[#allocation2 + $0x178] sm:$0xff] %v2397_v12  ;;  %v2398_v4 = vadd.f32 %v2319_v6, %v1917_v44 }
 0x304   : > { %v2321_v18 = vpop.f32.mrf.mxu0 }
 0x305   : > { %2462 = vst [vmem:[#allocation2 + $0x68] sm:$0xff] %v2398_v4  ;;  %v2399_v39 = vadd.f32 %v2321_v18, %v1918_v11 }
 0x306   : > { %v2325_v60 = vpop.f32.mrf.mxu0 }
 0x307   : > { %2463 = vst [vmem:[#allocation2 + $0x190] sm:$0xff] %v2399_v39  ;;  %v2400_v54 = vadd.f32 %v2325_v60, %v1919_v42 }
 0x308   : > { %v2327_v20 = vpop.f32.mrf.mxu0 }
 0x309   : > { %2464 = vst [vmem:[#allocation2 + $0x198] sm:$0xff] %v2400_v54  ;;  %v2401_v21 = vadd.f32 %v2327_v20, %v1920_v57 }
 0x30a   : > { %v2329_v61 = vpop.f32.mrf.mxu0 }
 0x30b   : > { %2465 = vst [vmem:[#allocation2 + $0x38] sm:$0xff] %v2401_v21  ;;  %v2402_v15 = vadd.f32 %v2329_v61, %v1921_v59 }
 0x30c   : > { %v2331_v10 = vpop.f32.mrf.mxu0 }
 0x30d   : > { %2466 = vst [vmem:[#allocation2 + $0xc0] sm:$0xff] %v2402_v15  ;;  %v2403_v3 = vadd.f32 %v2331_v10, %v1922_v1 }
 0x30e   : > { %v2335_v51 = vpop.f32.mrf.mxu0 }
 0x30f   : > { %2467 = vst [vmem:[#allocation2 + $0x1c0] sm:$0xff] %v2403_v3  ;;  %v2404_v45 = vadd.f32 %v2335_v51, %v1923_v24 }
 0x310   : > { %v2337_v27 = vpop.f32.mrf.mxu0 }
 0x311   : > { %2468 = vst [vmem:[#allocation2 + $0x158] sm:$0xff] %v2404_v45  ;;  %v2405_v30 = vadd.f32 %v2337_v27, %v1924_v47 }
 0x312   : > { %v2339_v28 = vpop.f32.mrf.mxu0 }
 0x313   : > { %2469 = vst [vmem:[#allocation2 + $0x10] sm:$0xff] %v2405_v30  ;;  %v2406_v9 = vadd.f32 %v2339_v28, %v1925_v32  ;;  %2475 = sbr.rel (%p3123_p1) target bundleno = 819 (0x333), region = 52 }
 0x314   : > { %v2341_v14 = vpop.f32.mrf.mxu0 }
 0x315   : > { %2470 = vst [vmem:[#allocation2 + $0x58] sm:$0xff] %v2406_v9  ;;  %v2407_v52 = vadd.f32 %v2341_v14, %v1926_v13 }
 0x317   : > { %2471 = vst [vmem:[#allocation2 + $0xa0] sm:$0xff] %v2407_v52 }
 0x318   : > { %v2476_v17 = vld [vmem:[#allocation2 + $0xb0] sm:$0xff]  ;;  %v2478_v62 = vld [vmem:[#allocation2 + $0xd8] sm:$0xff]  ;;  %v2481_v0 = vld [vmem:[#allocation2 + $0x168] sm:$0xff] }
 0x319   : > { %v2477_v48 = vld [vmem:[#allocation2 + $0x1b0] sm:$0xff]  ;;  %v2479_v55 = vld [vmem:[#allocation2 + $0x18] sm:$0xff]  ;;  %v2483_v49 = vld [vmem:[#allocation2 + $0x48] sm:$0xff] }
 0x31a   : > { %v3166_v25 = vpack.c.bf16 %v2477_v48, %v2476_v17  ;;  %v2480_v56 = vld [vmem:[#allocation2 + $0x50] sm:$0xff]  ;;  %v3167_v35 = vpack.c.bf16 %v2479_v55, %v2478_v62  ;;  %v2484_v58 = vld [vmem:[#allocation2 + $0x180] sm:$0xff]  ;;  %v2486_v2 = vld [vmem:[#allocation2 + $0x118] sm:$0xff] }
 0x31b   : > { %v3168_v5 = vpack.c.bf16 %v2481_v0, %v2480_v56  ;;  %v2482_v31 = vld [vmem:[#allocation2 + $0x130] sm:$0xff]  ;;  %v2487_v33 = vld [vmem:[#allocation2 + $0x98] sm:$0xff]  ;;  %v2488_v37 = vld [vmem:[#allocation2 + $0x120] sm:$0xff] }
 0x31c   : > { %2732 = vst [vmem:[%s4185_s1] sm:$0xff] %v3166_v25  ;;  %v3169_v22 = vpack.c.bf16 %v2483_v49, %v2482_v31  ;;  %v2485_v26 = vld [vmem:[#allocation2 + $0x110] sm:$0xff]  ;;  %2733 = vst [vmem:[%s4185_s1 + $0x8] sm:$0xff] %v3167_v35  ;;  %v3171_v53 = vpack.c.bf16 %v2487_v33, %v2486_v2  ;;  %v2490_v63 = vld [vmem:[#allocation2 + $0x108] sm:$0xff] }
 0x31d   : > { %2734 = vst [vmem:[%s4185_s1 + $0x10] sm:$0xff] %v3168_v5  ;;  %v3170_v8 = vpack.c.bf16 %v2485_v26, %v2484_v58  ;;  %v2489_v34 = vld [vmem:[#allocation2 + $0x150] sm:$0xff]  ;;  %v2491_v23 = vld [vmem:[#allocation2 + $0x60] sm:$0xff]  ;;  %v2493_v41 = vld [vmem:[#allocation2 + $0x188] sm:$0xff] }
 0x31e   : > { %2735 = vst [vmem:[%s4185_s1 + $0x18] sm:$0xff] %v3169_v22  ;;  %v3172_v16 = vpack.c.bf16 %v2489_v34, %v2488_v37  ;;  %v2492_v29 = vld [vmem:[#allocation2 + $0xe0] sm:$0xff]  ;;  %2737 = vst [vmem:[%s4185_s1 + $0x28] sm:$0xff] %v3171_v53  ;;  %v3173_v36 = vpack.c.bf16 %v2491_v23, %v2490_v63  ;;  %v2494_v43 = vld [vmem:[#allocation2 + $0x138] sm:$0xff] }
 0x31f   : > { %2736 = vst [vmem:[%s4185_s1 + $0x20] sm:$0xff] %v3170_v8  ;;  %v3174_v19 = vpack.c.bf16 %v2493_v41, %v2492_v29  ;;  %v2495_v40 = vld [vmem:[#allocation2 + $0x140] sm:$0xff]  ;;  %v2497_v46 = vld [vmem:[#allocation2 + $0x1a8] sm:$0xff]  ;;  %v2498_v50 = vld [vmem:[#allocation2 + $0x1b8] sm:$0xff] }
 0x320   : > { %v2496_v38 = vld [vmem:[#allocation2 + $0x80] sm:$0xff]  ;;  %2738 = vst [vmem:[%s4185_s1 + $0x30] sm:$0xff] %v3172_v16  ;;  %v3175_v7 = vpack.c.bf16 %v2495_v40, %v2494_v43  ;;  %v2499_v44 = vld [vmem:[#allocation2 + $0x28] sm:$0xff]  ;;  %2739 = vst [vmem:[%s4185_s1 + $0x38] sm:$0xff] %v3173_v36 }
 0x321   : > { %2740 = vst [vmem:[%s4185_s1 + $0x40] sm:$0xff] %v3174_v19  ;;  %v3176_v12 = vpack.c.bf16 %v2497_v46, %v2496_v38  ;;  %v3177_v6 = vpack.c.bf16 %v2499_v44, %v2498_v50  ;;  %v2500_v11 = vld [vmem:[#allocation2 + $0x1e8] sm:$0xff]  ;;  %v2501_v4 = vld [vmem:[#allocation2 + $0xf8] sm:$0xff]  ;;  %v2502_v18 = vld [vmem:[#allocation2 + $0x160] sm:$0xff] }
 0x322   : > { %2741 = vst [vmem:[%s4185_s1 + $0x48] sm:$0xff] %v3175_v7  ;;  %v3178_v42 = vpack.c.bf16 %v2501_v4, %v2500_v11  ;;  %v2503_v39 = vld [vmem:[#allocation2 + $0x30] sm:$0xff]  ;;  %v2504_v60 = vld [vmem:[#allocation2 + $0x1e0] sm:$0xff]  ;;  %v2507_v21 = vld [vmem:[#allocation2 + $0x8] sm:$0xff] }
 0x323   : > { %v2505_v57 = vld [vmem:[#allocation2] sm:$0xff]  ;;  %2742 = vst [vmem:[%s4185_s1 + $0x50] sm:$0xff] %v3176_v12  ;;  %2743 = vst [vmem:[%s4185_s1 + $0x58] sm:$0xff] %v3177_v6  ;;  %v3179_v54 = vpack.c.bf16 %v2503_v39, %v2502_v18  ;;  %v2506_v59 = vld [vmem:[#allocation2 + $0xf0] sm:$0xff] }
 0x324   : > { %v3180_v20 = vpack.c.bf16 %v2505_v57, %v2504_v60  ;;  %v2508_v61 = vld [vmem:[#allocation2 + $0x148] sm:$0xff]  ;;  %2744 = vst [vmem:[%s4185_s1 + $0x60] sm:$0xff] %v3178_v42  ;;  %v3181_v1 = vpack.c.bf16 %v2507_v21, %v2506_v59  ;;  %v2509_v15 = vld [vmem:[#allocation2 + $0x1d0] sm:$0xff]  ;;  %v2510_v10 = vld [vmem:[#allocation2 + $0x100] sm:$0xff] }
 0x325   : > { %v2511_v24 = vld [vmem:[#allocation2 + $0xc8] sm:$0xff]  ;;  %2745 = vst [vmem:[%s4185_s1 + $0x68] sm:$0xff] %v3179_v54  ;;  %v3182_v3 = vpack.c.bf16 %v2509_v15, %v2508_v61  ;;  %v2512_v47 = vld [vmem:[#allocation2 + $0x40] sm:$0xff]  ;;  %v2513_v45 = vld [vmem:[#allocation2 + $0x1f8] sm:$0xff] }
 0x326   : > { %2746 = vst [vmem:[%s4185_s1 + $0x70] sm:$0xff] %v3180_v20  ;;  %v3183_v51 = vpack.c.bf16 %v2511_v24, %v2510_v10  ;;  %v2514_v27 = vld [vmem:[#allocation2 + $0x20] sm:$0xff]  ;;  %2747 = vst [vmem:[%s4185_s1 + $0x78] sm:$0xff] %v3181_v1  ;;  %v3184_v32 = vpack.c.bf16 %v2513_v45, %v2512_v47  ;;  %v2515_v30 = vld [vmem:[#allocation2 + $0x128] sm:$0xff] }
 0x327   : > { %v2516_v28 = vld [vmem:[#allocation2 + $0x1a0] sm:$0xff]  ;;  %v2517_v13 = vld [vmem:[#allocation2 + $0x1f0] sm:$0xff]  ;;  %2748 = vst [vmem:[%s4185_s1 + $0x80] sm:$0xff] %v3182_v3  ;;  %v3185_v9 = vpack.c.bf16 %v2515_v30, %v2514_v27  ;;  %v2518_v52 = vld [vmem:[#allocation2 + $0xe8] sm:$0xff] }
 0x328   : > { %2749 = vst [vmem:[%s4185_s1 + $0x88] sm:$0xff] %v3183_v51  ;;  %v3186_v14 = vpack.c.bf16 %v2517_v13, %v2516_v28  ;;  %v2519_v17 = vld [vmem:[#allocation2 + $0x78] sm:$0xff]  ;;  %v2520_v48 = vld [vmem:[#allocation2 + $0x70] sm:$0xff]  ;;  %2750 = vst [vmem:[%s4185_s1 + $0x90] sm:$0xff] %v3184_v32 }
 0x329   : > { %v3187_v62 = vpack.c.bf16 %v2519_v17, %v2518_v52  ;;  %v2521_v25 = vld [vmem:[#allocation2 + $0x90] sm:$0xff]  ;;  %v2522_v55 = vld [vmem:[#allocation2 + $0x1d8] sm:$0xff]  ;;  %2751 = vst [vmem:[%s4185_s1 + $0x98] sm:$0xff] %v3185_v9  ;;  %v2525_v31 = vld [vmem:[#allocation2 + $0x88] sm:$0xff] }
 0x32a   : > { %v2523_v56 = vld [vmem:[#allocation2 + $0xd0] sm:$0xff]  ;;  %2752 = vst [vmem:[%s4185_s1 + $0xa0] sm:$0xff] %v3186_v14  ;;  %v3188_v0 = vpack.c.bf16 %v2521_v25, %v2520_v48  ;;  %v2524_v5 = vld [vmem:[#allocation2 + $0xb8] sm:$0xff]  ;;  %v2526_v49 = vld [vmem:[#allocation2 + $0xa8] sm:$0xff] }
 0x32b   : > { %v3189_v35 = vpack.c.bf16 %v2523_v56, %v2522_v55  ;;  %2753 = vst [vmem:[%s4185_s1 + $0xa8] sm:$0xff] %v3187_v62  ;;  %v3190_v58 = vpack.c.bf16 %v2525_v31, %v2524_v5  ;;  %v2527_v22 = vld [vmem:[#allocation2 + $0x1c8] sm:$0xff]  ;;  %v2528_v26 = vld [vmem:[#allocation2 + $0x170] sm:$0xff]  ;;  %v2529_v2 = vld [vmem:[#allocation2 + $0x178] sm:$0xff] }
 0x32c   : > { %2754 = vst [vmem:[%s4185_s1 + $0xb0] sm:$0xff] %v3188_v0  ;;  %v3191_v33 = vpack.c.bf16 %v2527_v22, %v2526_v49  ;;  %v3192_v8 = vpack.c.bf16 %v2529_v2, %v2528_v26  ;;  %v2530_v53 = vld [vmem:[#allocation2 + $0x68] sm:$0xff]  ;;  %v2531_v37 = vld [vmem:[#allocation2 + $0x190] sm:$0xff]  ;;  %v2532_v34 = vld [vmem:[#allocation2 + $0x198] sm:$0xff] }
 0x32d   : > { %2755 = vst [vmem:[%s4185_s1 + $0xb8] sm:$0xff] %v3189_v35  ;;  %2756 = vst [vmem:[%s4185_s1 + $0xc0] sm:$0xff] %v3190_v58  ;;  %v3193_v63 = vpack.c.bf16 %v2531_v37, %v2530_v53  ;;  %v2533_v16 = vld [vmem:[#allocation2 + $0x38] sm:$0xff]  ;;  %v2534_v23 = vld [vmem:[#allocation2 + $0xc0] sm:$0xff] }
 0x32e   : > { %v2535_v29 = vld [vmem:[#allocation2 + $0x1c0] sm:$0xff]  ;;  %2757 = vst [vmem:[%s4185_s1 + $0xc8] sm:$0xff] %v3191_v33  ;;  %2758 = vst [vmem:[%s4185_s1 + $0xd0] sm:$0xff] %v3192_v8  ;;  %v3194_v41 = vpack.c.bf16 %v2533_v16, %v2532_v34  ;;  %v2536_v19 = vld [vmem:[#allocation2 + $0x158] sm:$0xff] }
 0x32f   : > { %v3195_v36 = vpack.c.bf16 %v2535_v29, %v2534_v23  ;;  %v2537_v43 = vld [vmem:[#allocation2 + $0x10] sm:$0xff]  ;;  %v2538_v40 = vld [vmem:[#allocation2 + $0x58] sm:$0xff]  ;;  %2759 = vst [vmem:[%s4185_s1 + $0xd8] sm:$0xff] %v3193_v63  ;;  %v2539_v7 = vld [vmem:[#allocation2 + $0xa0] sm:$0xff] }
 0x330   : > { %v3196_v38 = vpack.c.bf16 %v2537_v43, %v2536_v19  ;;  %2760 = vst [vmem:[%s4185_s1 + $0xe0] sm:$0xff] %v3194_v41  ;;  %v3197_v46 = vpack.c.bf16 %v2539_v7, %v2538_v40 }
 0x331   : > { %2761 = vst [vmem:[%s4185_s1 + $0xe8] sm:$0xff] %v3195_v36 }
 0x332   : > { %2762 = vst [vmem:[%s4185_s1 + $0xf0] sm:$0xff] %v3196_v38  ;;  %2763 = vst [vmem:[%s4185_s1 + $0xf8] sm:$0xff] %v3197_v46 }
 0x333 PF: > { %s3199_s21 = sshll.u32 %s3961_s22, 12  ;;  %s2779_s27 = sshll.u32 %s4185_s1, 4  ;;  %s4912_s27 = int_to_ptr.vmem [resolvable:$true] %s2779_s27 }
 0x334   : > { %s4909_s13 = scalar_lea.hbm %s4980_s4, %s3199_s21  ;;  %s4916_s14 = scalar_lea.sflag [#allocation5], %s301_s17 }
 0x335   : > { %s3849_s30 = scalar_lea.vmem %s4912_s27, 4096  ;;  %s3981_s22 = smov [#allocation8]  }
 0x336   : > { %p3850_p7 = scmp.ne.s32.totalorder %s4912_s27, %s3849_s30  ;;  %s3853_s29 = sshll.u32 %s3981_s22, 4  ;;  %s3854_s29 = int_to_ptr.vmem [resolvable:$false] %s3853_s29 }
 0x337   : > { %s3855_s11 = scalar_lea.vmem %s3854_s29, 8192  ;;  %p3856_p3 = scmp.lt.s32.totalorder %s4912_s27, %s3854_s29 }
 0x338   : > { %p3851_p9 = pnand %p3850_p7, %p4097_p12  ;;  %p3857_p11 = scmp.lt.s32.totalorder %s3855_s11, %s3849_s30 }
 0x33a   : > { %p3852_p10 = pneg %p3851_p9  ;;  %p3858_p5 = por %p3857_p11, %p3856_p3 }
 0x33c   : > { %p3859_p13 = pnand %p3858_p5, %p3852_p10 }
 0x33e   : > { %3862 = shalt.err (!%p3859_p13)
}
 0x33f   : > { %s3863_s17 = scalar_lea.hbm %s4909_s13, 4096  ;;  %s3867_s10 = scalar_lea.hbm %s4980_s4, 8192 }
 0x340   : > { %p3864_p0 = scmp.ne.s32.totalorder %s4909_s13, %s3863_s17  ;;  %p3868_p8 = scmp.lt.s32.totalorder %s4909_s13, %s4980_s4 }
 0x341   : > { %p3869_p1 = scmp.lt.s32.totalorder %s3867_s10, %s3863_s17 }
 0x342   : > { %p3865_p4 = pnand %p3864_p0, %p4097_p12 }
 0x343   : > { %p3870_p7 = por %p3869_p1, %p3868_p8 }
 0x344   : > { %p3866_p6 = pneg %p3865_p4 }
 0x346   : > { %p3871_p9 = pnand %p3870_p7, %p3866_p6 }
 0x348   : > { %3874 = shalt.err (!%p3871_p9)
}
 0x349   : > { %s3982_s8 = smov 128   ;;  %s3983_s6 = smov 8  }
 0x34a   : > { %3236 = dma.vmem_to_hbm [thread:$0]  (%p4097_p12), %s4912_s27, 4096, %s4909_s13, %s4916_s14, %s3982_s8, %s3982_s8, %s3983_s6  }
 0x34b PF: > { %p3250_p10 = scmp.ge.s32.totalorder %s3973_s25, 2  ;;  %s2794_s9 = sand.u32 1, %s3933_s15  }
 0x34c   : > { %s2795_s1 = scalar_lea.sflag [#allocation5], %s2794_s9 }
 0x34d   : > { %p3246_p3 = pnand %p3250_p10, %p4107_p2 }
 0x34f   : > { %p3247_p11 = pneg %p3246_p3 }
 0x351   : > { %3928 = dma.done.wait (%p3247_p11), %s2795_s1, 4096  }
 0x352   : > { %3930 = vsyncadd (%p3247_p11), %s2795_s1, 4294963200  ;;  %s23_s25 = sadd.s32 1, %s3973_s25   ;;  %s5053_s21 = sld [smem:[#allocation12_spill]] }
 0x353   : > { %p20_p5 = scmp.ge.s32.totalorder %s23_s25, 10   ;;  %s5054_s17 = sld [smem:[#allocation18_spill]] }
 0x354   : > { %s5055_s12 = sld [smem:[#allocation13_spill]]  ;;  %s5060_s15 = smov %s3937_s16 }
 0x355   : > { %s5056_s20 = sld [smem:[#allocation17_spill]]  ;;  %s5062_s18 = smov %s3949_s19 }
 0x356   : > { %s5057_s22 = sld [smem:[#allocation14_spill]] }
 0x357   : > { %s5058_s7 = sld [smem:[#allocation15_spill]] }
 0x358   : > { %s5059_s24 = sld [smem:[#allocation16_spill]]  ;;  %s5061_s16 = smov %s5053_s21 }
 0x359   : > { %s5064_s21 = smov %s3965_s23  ;;  %22 = sbr.rel (!%p20_p5) target bundleno = 13 (0xd), region = 108 }
 0x35a   : > { %s5063_s19 = smov %s5055_s12 }
 0x35d   : > { %s5065_s23 = smov %s5058_s7 }
 0x35e   :  { %2800 = vsyncpa [#allocation4], 1 }
 0x35f   :  { %2802 = vsyncpa [#allocation4 + $0x1], 1 }
 0x360   :  { %2803 = vsyncpa [#allocation7], 1 }
 0x361   :  { %2805 = vsyncpa [#allocation7 + $0x1], 1 }
 0x362   :  { %2806 = vsyncpa [#allocation5], 1 }
 0x363   :  { %2808 = vsyncpa [#allocation5 + $0x1], 1 }

</bundles_post_ra>
